<compile_context>
chip_gen: v5e
topology: v5e:2x2
jax: 0.10.0
libtpu: 0.0.40
codegen_flags: <defaults>
</compile_context>

<pallas_src>
import functools

import jax
import jax.numpy as jnp
from jax.experimental import pallas as pl
from jax.experimental.pallas import tpu as pltpu


# ---------------------------------------------------------------------------
# One GAT attention block (single head), f32 throughout:
#   e[i,j] = LeakyReLU(a_dst[i] + a_src[j]) + mask ; softmax over j ; out = alpha @ h
# ---------------------------------------------------------------------------
def _gat_attention(h_feat, a_dst_col, a_src_row, bias_mask):
    e = a_dst_col + a_src_row                              # (N, N)
    e = jnp.where(e > 0, e, 0.2 * e)                       # LeakyReLU(0.2), PyG default
    e = e + bias_mask                                      # 0 on edges, -1e9 on non-edges
    e = e - jnp.max(e, axis=-1, keepdims=True)             # self-loops guarantee a hit
    p = jnp.exp(e)
    alpha = p * pl.reciprocal(jnp.sum(p, axis=-1, keepdims=True), approx=False)
    return jnp.dot(alpha, h_feat, preferred_element_type=jnp.float32)


# ---------------------------------------------------------------------------
# Fully fused forward kernel: conv1 (8 heads) + ELU + conv2 (1 head) + ELU + pool + fc
# ---------------------------------------------------------------------------
def gat_fused_kernel(heads,
                     x_ref, mask_ref, w1_ref, watt1_ref, b1_ref,
                     w2_ref, watt2_ref, b2_ref, pool_ref, wfc_ref, bfc_ref,
                     logits_ref):
    x = x_ref[...]                                         # (N, F)
    bias_mask = mask_ref[...]                              # (N, N)

    # ---- conv1: all 8 heads in one feature matmul + one tiny attention matmul ----
    h_all = jnp.dot(x, w1_ref[...], preferred_element_type=jnp.float32)      # (N, 8C)
    att1 = jnp.dot(x, watt1_ref[...], preferred_element_type=jnp.float32)    # (N, 2H)
    att1_src_t = jnp.transpose(att1[:, :heads])                              # (H, N)
    c = h_all.shape[-1] // heads

    head_outs = []
    for h in range(heads):                    # static unroll; 128-lane aligned slices
        head_outs.append(_gat_attention(
            h_all[:, h * c:(h + 1) * c],                   # (N, C)
            att1[:, heads + h:heads + h + 1],              # (N, 1) target term
            att1_src_t[h:h + 1, :],                        # (1, N) source term
            bias_mask))
    h1 = jnp.concatenate(head_outs, axis=-1) + b1_ref[...]                   # (N, 8C)
    h1 = jnp.where(h1 > 0, h1, jnp.exp(h1) - 1.0)                            # ELU

    # ---- conv2 (heads=1) ----
    h2 = jnp.dot(h1, w2_ref[...], preferred_element_type=jnp.float32)        # (N, C)
    att2 = jnp.dot(h1, watt2_ref[...], preferred_element_type=jnp.float32)   # (N, 2)
    out2 = _gat_attention(h2,
                          att2[:, 1:2],
                          jnp.transpose(att2[:, 0:1]),
                          bias_mask) + b2_ref[...]
    out2 = jnp.where(out2 > 0, out2, jnp.exp(out2) - 1.0)                    # ELU

    # ---- global_mean_pool + fc ----
    pooled = jnp.dot(pool_ref[...], out2, preferred_element_type=jnp.float32)  # (G, C)
    logits_ref[...] = (jnp.dot(pooled, wfc_ref[...],
                               preferred_element_type=jnp.float32)
                       + bfc_ref[...]).astype(logits_ref.dtype)


def gat_forward_fused(x, bias_mask, pool_mat, params, *, heads):
    n, f_in = x.shape
    w1_all, watt1 = params["w1_all"], params["watt1"]
    w2, watt2 = params["w2"], params["watt2"]
    wfc, bfc = params["wfc"], params["bfc"]
    c = w2.shape[-1]
    g = pool_mat.shape[0]
    k = wfc.shape[-1]

    def full(shape):
        return pl.BlockSpec(shape, lambda i: (0,) * len(shape))

    return pl.pallas_call(
        functools.partial(gat_fused_kernel, heads),
        out_shape=jax.ShapeDtypeStruct((g, k), jnp.float32),
        grid=(1,),
        in_specs=[
            full((n, f_in)),            # x
            full((n, n)),               # additive adjacency mask
            full((f_in, heads * c)),    # [W_h0 | ... | W_h7]
            full((f_in, 2 * heads)),    # [W_h @ a_src_h^T ... | W_h @ a_dst_h^T ...]
            full((1, heads * c)),       # conv1 bias
            full((heads * c, c)),       # conv2 weight
            full((heads * c, 2)),       # conv2 attention columns
            full((1, c)),               # conv2 bias
            full((g, n)),               # mean-pool matrix
            full((c, k)),               # fc weight
            full((1, k)),               # fc bias
        ],
        out_specs=full((g, k)),
        compiler_params=pltpu.CompilerParams(dimension_semantics=("arbitrary",)),
    )(x, bias_mask, w1_all, watt1, params["b1"], w2, watt2, params["b2"],
      pool_mat, wfc, bfc)


# ---------------------------------------------------------------------------
# Glue: weight layout, graph construction, parameter init
# ---------------------------------------------------------------------------
def make_gat_weights(w, att_src, att_dst):
    # w: (H, F, C); att_*: (H, 1, C)
    hh, f, c = w.shape
    w_all = jnp.transpose(w, (1, 0, 2)).reshape(f, hh * c)       # cols [W_h0 | ... ]
    src_cols = jnp.einsum("hfc,hxc->fh", w, att_src)             # (F, H): W_h @ a_src_h^T
    dst_cols = jnp.einsum("hfc,hxc->fh", w, att_dst)             # (F, H)
    w_att = jnp.concatenate([src_cols, dst_cols], axis=-1)       # (F, 2H)
    return w_all, w_att


def prepare_params(raw):
    w1_all, watt1 = make_gat_weights(raw["w1"], raw["as1"], raw["ad1"])
    w2_all, watt2 = make_gat_weights(raw["w2"], raw["as2"], raw["ad2"])
    return {"w1_all": w1_all, "watt1": watt1, "b1": raw["b1"],
            "w2": w2_all, "watt2": watt2, "b2": raw["b2"],
            "wfc": raw["wfc"], "bfc": raw["bfc"]}


def build_adj_bias(edge_index, n):
    # TODO(synk): dynamic scatter of edge_index into a dense mask has no clean in-kernel
    # Pallas equivalent; built in JAX glue (adj[target, source] = 1, + self-loops).
    adj = jnp.zeros((n, n), jnp.float32)
    adj = adj.at[edge_index[1], edge_index[0]].set(1.0)
    adj = adj.at[jnp.arange(n), jnp.arange(n)].set(1.0)
    return (adj - 1.0) * 1e9       # additive softmax mask: 0 on edges, -1e9 elsewhere


def build_pool_matrix(batch, num_graphs):
    onehot = (batch[None, :] == jnp.arange(num_graphs)[:, None]).astype(jnp.float32)
    counts = jnp.maximum(jnp.sum(onehot, axis=1, keepdims=True), 1.0)
    return onehot / counts


def glorot(key, shape, fan_in, fan_out):
    limit = (6.0 / (fan_in + fan_out)) ** 0.5
    return jax.random.uniform(key, shape, jnp.float32, -limit, limit)


def init_raw_params(key, f_in, hidden, heads, num_classes):
    ks = jax.random.split(key, 8)
    lin_bound = 1.0 / (hidden ** 0.5)
    return {
        # GATConv 1: in=f_in, out=hidden, heads=heads, concat=True
        "w1": glorot(ks[0], (heads, f_in, hidden), f_in, heads * hidden),
        "as1": glorot(ks[1], (heads, 1, hidden), hidden, 1),
        "ad1": glorot(ks[2], (heads, 1, hidden), hidden, 1),
        "b1": jnp.zeros((1, heads * hidden), jnp.float32),
        # GATConv 2: in=heads*hidden, out=hidden, heads=1, concat=True
        "w2": glorot(ks[3], (1, heads * hidden, hidden), heads * hidden, hidden),
        "as2": glorot(ks[4], (1, 1, hidden), hidden, 1),
        "ad2": glorot(ks[5], (1, 1, hidden), hidden, 1),
        "b2": jnp.zeros((1, hidden), jnp.float32),
        # fc: Linear(hidden, num_classes) -- torch-style uniform init
        "wfc": jax.random.uniform(ks[6], (hidden, num_classes), jnp.float32,
                                  -lin_bound, lin_bound),
        "bfc": jax.random.uniform(ks[7], (1, num_classes), jnp.float32,
                                  -lin_bound, lin_bound),
    }


if __name__ == "__main__":
    N = 16             # total nodes (2 graphs x 8 nodes)
    F_IN = 16          # num_node_features
    HIDDEN = 128       # hidden_channels (module default) -> lane-dense tiles
    HEADS = 8
    NUM_CLASSES = 4
    NUM_GRAPHS = 2
    E_PER_G = 24

    key = jax.random.PRNGKey(0)
    kx, ke0, ke1, ke2, ke3, kp = jax.random.split(key, 6)

    x = jax.random.normal(kx, (N, F_IN), jnp.float32)

    # edges within each of the two graphs (graph 0: nodes 0..7, graph 1: nodes 8..15)
    src0 = jax.random.randint(ke0, (E_PER_G,), 0, 8)
    dst0 = jax.random.randint(ke1, (E_PER_G,), 0, 8)
    src1 = jax.random.randint(ke2, (E_PER_G,), 0, 8) + 8
    dst1 = jax.random.randint(ke3, (E_PER_G,), 0, 8) + 8
    edge_index = jnp.stack([jnp.concatenate([src0, src1]),
                            jnp.concatenate([dst0, dst1])])          # (2, E)
    batch = jnp.concatenate([jnp.zeros(8, jnp.int32), jnp.ones(8, jnp.int32)])

    adj_bias = build_adj_bias(edge_index, N)
    pool_mat = build_pool_matrix(batch, NUM_GRAPHS)
    raw_params = init_raw_params(kp, F_IN, HIDDEN, HEADS, NUM_CLASSES)

    @jax.jit
    def run(x_, mask_, pool_, raw_):
        return gat_forward_fused(x_, mask_, pool_, prepare_params(raw_), heads=HEADS)

    logits = run(x, adj_bias, pool_mat, raw_params)                   # (NUM_GRAPHS, K)
    jax.block_until_ready(logits)
    assert logits.shape == (NUM_GRAPHS, NUM_CLASSES)
    print("KERNEL_OK")
</pallas_src>

<mosaic_0001>
module attributes {stable_mosaic.version = 11 : i64} {
  func.func @gat_fused_kernel(%arg0: i32, %arg1: memref<16x16xf32, #tpu.memory_space<vmem>>, %arg2: memref<16x16xf32, #tpu.memory_space<vmem>>, %arg3: memref<16x1024xf32, #tpu.memory_space<vmem>>, %arg4: memref<16x16xf32, #tpu.memory_space<vmem>>, %arg5: memref<1x1024xf32, #tpu.memory_space<vmem>>, %arg6: memref<1024x128xf32, #tpu.memory_space<vmem>>, %arg7: memref<1024x2xf32, #tpu.memory_space<vmem>>, %arg8: memref<1x128xf32, #tpu.memory_space<vmem>>, %arg9: memref<2x16xf32, #tpu.memory_space<vmem>>, %arg10: memref<128x4xf32, #tpu.memory_space<vmem>>, %arg11: memref<1x4xf32, #tpu.memory_space<vmem>>, %arg12: memref<2x4xf32, #tpu.memory_space<vmem>>) attributes {dimension_semantics = [#tpu.dimension_semantics<arbitrary>], iteration_bounds = array<i64: 1>, scalar_prefetch = 0 : i64, scratch_operands = 0 : i64, tpu.core_type = #tpu.core_type<tc>, window_params = [{pipeline_mode = #tpu.pipeline_mode<synchronous>, transform_indices = @transform_0, window_bounds = array<i64: 16, 16>}, {pipeline_mode = #tpu.pipeline_mode<synchronous>, transform_indices = @transform_1, window_bounds = array<i64: 16, 16>}, {pipeline_mode = #tpu.pipeline_mode<synchronous>, transform_indices = @transform_2, window_bounds = array<i64: 16, 1024>}, {pipeline_mode = #tpu.pipeline_mode<synchronous>, transform_indices = @transform_3, window_bounds = array<i64: 16, 16>}, {pipeline_mode = #tpu.pipeline_mode<synchronous>, transform_indices = @transform_4, window_bounds = array<i64: 1, 1024>}, {pipeline_mode = #tpu.pipeline_mode<synchronous>, transform_indices = @transform_5, window_bounds = array<i64: 1024, 128>}, {pipeline_mode = #tpu.pipeline_mode<synchronous>, transform_indices = @transform_6, window_bounds = array<i64: 1024, 2>}, {pipeline_mode = #tpu.pipeline_mode<synchronous>, transform_indices = @transform_7, window_bounds = array<i64: 1, 128>}, {pipeline_mode = #tpu.pipeline_mode<synchronous>, transform_indices = @transform_8, window_bounds = array<i64: 2, 16>}, {pipeline_mode = #tpu.pipeline_mode<synchronous>, transform_indices = @transform_9, window_bounds = array<i64: 128, 4>}, {pipeline_mode = #tpu.pipeline_mode<synchronous>, transform_indices = @transform_10, window_bounds = array<i64: 1, 4>}, {pipeline_mode = #tpu.pipeline_mode<synchronous>, transform_indices = @transform_11, window_bounds = array<i64: 2, 4>}]} {
    %c0 = arith.constant 0 : index
    %c0_0 = arith.constant 0 : index
    %0 = vector.load %arg1[%c0, %c0_0] : memref<16x16xf32, #tpu.memory_space<vmem>>, vector<16x16xf32>
    %c0_1 = arith.constant 0 : index
    %c0_2 = arith.constant 0 : index
    %1 = vector.load %arg2[%c0_1, %c0_2] : memref<16x16xf32, #tpu.memory_space<vmem>>, vector<16x16xf32>
    %c0_3 = arith.constant 0 : index
    %c0_4 = arith.constant 0 : index
    %2 = vector.load %arg3[%c0_3, %c0_4] : memref<16x1024xf32, #tpu.memory_space<vmem>>, vector<16x1024xf32>
    %cst = arith.constant dense<0.000000e+00> : vector<16x1024xf32>
    %3 = tpu.matmul %0, %2, %cst {dimension_numbers = #tpu.dot_dimension_numbers<[1], [0], [0], [1], [0, 0, 1, 1], [], []>} : vector<16x16xf32>, vector<16x1024xf32>, vector<16x1024xf32> -> vector<16x1024xf32>
    %c0_5 = arith.constant 0 : index
    %c0_6 = arith.constant 0 : index
    %4 = vector.load %arg4[%c0_5, %c0_6] : memref<16x16xf32, #tpu.memory_space<vmem>>, vector<16x16xf32>
    %cst_7 = arith.constant dense<0.000000e+00> : vector<16x16xf32>
    %5 = tpu.matmul %0, %4, %cst_7 {dimension_numbers = #tpu.dot_dimension_numbers<[1], [0], [0], [1], [0, 0, 1, 1], [], []>} : vector<16x16xf32>, vector<16x16xf32>, vector<16x16xf32> -> vector<16x16xf32>
    %6 = vector.extract_strided_slice %5 {offsets = [0, 0], sizes = [16, 8], strides = [1, 1]} : vector<16x16xf32> to vector<16x8xf32>
    %7 = tpu.transpose %6, [1, 0] : vector<16x8xf32> -> vector<8x16xf32>
    %8 = vector.extract_strided_slice %3 {offsets = [0, 0], sizes = [16, 128], strides = [1, 1]} : vector<16x1024xf32> to vector<16x128xf32>
    %9 = vector.extract_strided_slice %5 {offsets = [0, 8], sizes = [16, 1], strides = [1, 1]} : vector<16x16xf32> to vector<16x1xf32>
    %10 = vector.extract_strided_slice %7 {offsets = [0, 0], sizes = [1, 16], strides = [1, 1]} : vector<8x16xf32> to vector<1x16xf32>
    %11 = vector.broadcast %9 : vector<16x1xf32> to vector<16x16xf32>
    %12 = vector.broadcast %10 : vector<1x16xf32> to vector<16x16xf32>
    %13 = arith.addf %11, %12 : vector<16x16xf32>
    %cst_8 = arith.constant 0.000000e+00 : f32
    %14 = vector.broadcast %cst_8 : f32 to vector<16x16xf32>
    %15 = arith.cmpf ogt, %13, %14 : vector<16x16xf32>
    %cst_9 = arith.constant 2.000000e-01 : f32
    %16 = vector.broadcast %cst_9 : f32 to vector<16x16xf32>
    %17 = arith.mulf %16, %13 : vector<16x16xf32>
    %18 = arith.select %15, %13, %17 : vector<16x16xi1>, vector<16x16xf32>
    %19 = arith.addf %18, %1 : vector<16x16xf32>
    %cst_10 = arith.constant dense<0xFF800000> : vector<16xf32>
    %20 = vector.multi_reduction <maximumf>, %19, %cst_10 [1] : vector<16x16xf32> to vector<16xf32>
    %21 = vector.shape_cast %20 : vector<16xf32> to vector<16x1xf32>
    %22 = vector.broadcast %21 : vector<16x1xf32> to vector<16x16xf32>
    %23 = arith.subf %19, %22 : vector<16x16xf32>
    %24 = math.exp %23 : vector<16x16xf32>
    %cst_11 = arith.constant dense<0.000000e+00> : vector<16xf32>
    %25 = vector.multi_reduction <add>, %24, %cst_11 [1] : vector<16x16xf32> to vector<16xf32>
    %26 = vector.shape_cast %25 : vector<16xf32> to vector<16x1xf32>
    %27 = tpu.reciprocal %26 : vector<16x1xf32> -> vector<16x1xf32>
    %28 = vector.broadcast %27 : vector<16x1xf32> to vector<16x16xf32>
    %29 = arith.mulf %24, %28 : vector<16x16xf32>
    %cst_12 = arith.constant dense<0.000000e+00> : vector<16x128xf32>
    %30 = tpu.matmul %29, %8, %cst_12 {dimension_numbers = #tpu.dot_dimension_numbers<[1], [0], [0], [1], [0, 0, 1, 1], [], []>} : vector<16x16xf32>, vector<16x128xf32>, vector<16x128xf32> -> vector<16x128xf32>
    %31 = vector.extract_strided_slice %3 {offsets = [0, 128], sizes = [16, 128], strides = [1, 1]} : vector<16x1024xf32> to vector<16x128xf32>
    %32 = vector.extract_strided_slice %5 {offsets = [0, 9], sizes = [16, 1], strides = [1, 1]} : vector<16x16xf32> to vector<16x1xf32>
    %33 = vector.extract_strided_slice %7 {offsets = [1, 0], sizes = [1, 16], strides = [1, 1]} : vector<8x16xf32> to vector<1x16xf32>
    %34 = vector.broadcast %32 : vector<16x1xf32> to vector<16x16xf32>
    %35 = vector.broadcast %33 : vector<1x16xf32> to vector<16x16xf32>
    %36 = arith.addf %34, %35 : vector<16x16xf32>
    %cst_13 = arith.constant 0.000000e+00 : f32
    %37 = vector.broadcast %cst_13 : f32 to vector<16x16xf32>
    %38 = arith.cmpf ogt, %36, %37 : vector<16x16xf32>
    %cst_14 = arith.constant 2.000000e-01 : f32
    %39 = vector.broadcast %cst_14 : f32 to vector<16x16xf32>
    %40 = arith.mulf %39, %36 : vector<16x16xf32>
    %41 = arith.select %38, %36, %40 : vector<16x16xi1>, vector<16x16xf32>
    %42 = arith.addf %41, %1 : vector<16x16xf32>
    %cst_15 = arith.constant dense<0xFF800000> : vector<16xf32>
    %43 = vector.multi_reduction <maximumf>, %42, %cst_15 [1] : vector<16x16xf32> to vector<16xf32>
    %44 = vector.shape_cast %43 : vector<16xf32> to vector<16x1xf32>
    %45 = vector.broadcast %44 : vector<16x1xf32> to vector<16x16xf32>
    %46 = arith.subf %42, %45 : vector<16x16xf32>
    %47 = math.exp %46 : vector<16x16xf32>
    %cst_16 = arith.constant dense<0.000000e+00> : vector<16xf32>
    %48 = vector.multi_reduction <add>, %47, %cst_16 [1] : vector<16x16xf32> to vector<16xf32>
    %49 = vector.shape_cast %48 : vector<16xf32> to vector<16x1xf32>
    %50 = tpu.reciprocal %49 : vector<16x1xf32> -> vector<16x1xf32>
    %51 = vector.broadcast %50 : vector<16x1xf32> to vector<16x16xf32>
    %52 = arith.mulf %47, %51 : vector<16x16xf32>
    %cst_17 = arith.constant dense<0.000000e+00> : vector<16x128xf32>
    %53 = tpu.matmul %52, %31, %cst_17 {dimension_numbers = #tpu.dot_dimension_numbers<[1], [0], [0], [1], [0, 0, 1, 1], [], []>} : vector<16x16xf32>, vector<16x128xf32>, vector<16x128xf32> -> vector<16x128xf32>
    %54 = vector.extract_strided_slice %3 {offsets = [0, 256], sizes = [16, 128], strides = [1, 1]} : vector<16x1024xf32> to vector<16x128xf32>
    %55 = vector.extract_strided_slice %5 {offsets = [0, 10], sizes = [16, 1], strides = [1, 1]} : vector<16x16xf32> to vector<16x1xf32>
    %56 = vector.extract_strided_slice %7 {offsets = [2, 0], sizes = [1, 16], strides = [1, 1]} : vector<8x16xf32> to vector<1x16xf32>
    %57 = vector.broadcast %55 : vector<16x1xf32> to vector<16x16xf32>
    %58 = vector.broadcast %56 : vector<1x16xf32> to vector<16x16xf32>
    %59 = arith.addf %57, %58 : vector<16x16xf32>
    %cst_18 = arith.constant 0.000000e+00 : f32
    %60 = vector.broadcast %cst_18 : f32 to vector<16x16xf32>
    %61 = arith.cmpf ogt, %59, %60 : vector<16x16xf32>
    %cst_19 = arith.constant 2.000000e-01 : f32
    %62 = vector.broadcast %cst_19 : f32 to vector<16x16xf32>
    %63 = arith.mulf %62, %59 : vector<16x16xf32>
    %64 = arith.select %61, %59, %63 : vector<16x16xi1>, vector<16x16xf32>
    %65 = arith.addf %64, %1 : vector<16x16xf32>
    %cst_20 = arith.constant dense<0xFF800000> : vector<16xf32>
    %66 = vector.multi_reduction <maximumf>, %65, %cst_20 [1] : vector<16x16xf32> to vector<16xf32>
    %67 = vector.shape_cast %66 : vector<16xf32> to vector<16x1xf32>
    %68 = vector.broadcast %67 : vector<16x1xf32> to vector<16x16xf32>
    %69 = arith.subf %65, %68 : vector<16x16xf32>
    %70 = math.exp %69 : vector<16x16xf32>
    %cst_21 = arith.constant dense<0.000000e+00> : vector<16xf32>
    %71 = vector.multi_reduction <add>, %70, %cst_21 [1] : vector<16x16xf32> to vector<16xf32>
    %72 = vector.shape_cast %71 : vector<16xf32> to vector<16x1xf32>
    %73 = tpu.reciprocal %72 : vector<16x1xf32> -> vector<16x1xf32>
    %74 = vector.broadcast %73 : vector<16x1xf32> to vector<16x16xf32>
    %75 = arith.mulf %70, %74 : vector<16x16xf32>
    %cst_22 = arith.constant dense<0.000000e+00> : vector<16x128xf32>
    %76 = tpu.matmul %75, %54, %cst_22 {dimension_numbers = #tpu.dot_dimension_numbers<[1], [0], [0], [1], [0, 0, 1, 1], [], []>} : vector<16x16xf32>, vector<16x128xf32>, vector<16x128xf32> -> vector<16x128xf32>
    %77 = vector.extract_strided_slice %3 {offsets = [0, 384], sizes = [16, 128], strides = [1, 1]} : vector<16x1024xf32> to vector<16x128xf32>
    %78 = vector.extract_strided_slice %5 {offsets = [0, 11], sizes = [16, 1], strides = [1, 1]} : vector<16x16xf32> to vector<16x1xf32>
    %79 = vector.extract_strided_slice %7 {offsets = [3, 0], sizes = [1, 16], strides = [1, 1]} : vector<8x16xf32> to vector<1x16xf32>
    %80 = vector.broadcast %78 : vector<16x1xf32> to vector<16x16xf32>
    %81 = vector.broadcast %79 : vector<1x16xf32> to vector<16x16xf32>
    %82 = arith.addf %80, %81 : vector<16x16xf32>
    %cst_23 = arith.constant 0.000000e+00 : f32
    %83 = vector.broadcast %cst_23 : f32 to vector<16x16xf32>
    %84 = arith.cmpf ogt, %82, %83 : vector<16x16xf32>
    %cst_24 = arith.constant 2.000000e-01 : f32
    %85 = vector.broadcast %cst_24 : f32 to vector<16x16xf32>
    %86 = arith.mulf %85, %82 : vector<16x16xf32>
    %87 = arith.select %84, %82, %86 : vector<16x16xi1>, vector<16x16xf32>
    %88 = arith.addf %87, %1 : vector<16x16xf32>
    %cst_25 = arith.constant dense<0xFF800000> : vector<16xf32>
    %89 = vector.multi_reduction <maximumf>, %88, %cst_25 [1] : vector<16x16xf32> to vector<16xf32>
    %90 = vector.shape_cast %89 : vector<16xf32> to vector<16x1xf32>
    %91 = vector.broadcast %90 : vector<16x1xf32> to vector<16x16xf32>
    %92 = arith.subf %88, %91 : vector<16x16xf32>
    %93 = math.exp %92 : vector<16x16xf32>
    %cst_26 = arith.constant dense<0.000000e+00> : vector<16xf32>
    %94 = vector.multi_reduction <add>, %93, %cst_26 [1] : vector<16x16xf32> to vector<16xf32>
    %95 = vector.shape_cast %94 : vector<16xf32> to vector<16x1xf32>
    %96 = tpu.reciprocal %95 : vector<16x1xf32> -> vector<16x1xf32>
    %97 = vector.broadcast %96 : vector<16x1xf32> to vector<16x16xf32>
    %98 = arith.mulf %93, %97 : vector<16x16xf32>
    %cst_27 = arith.constant dense<0.000000e+00> : vector<16x128xf32>
    %99 = tpu.matmul %98, %77, %cst_27 {dimension_numbers = #tpu.dot_dimension_numbers<[1], [0], [0], [1], [0, 0, 1, 1], [], []>} : vector<16x16xf32>, vector<16x128xf32>, vector<16x128xf32> -> vector<16x128xf32>
    %100 = vector.extract_strided_slice %3 {offsets = [0, 512], sizes = [16, 128], strides = [1, 1]} : vector<16x1024xf32> to vector<16x128xf32>
    %101 = vector.extract_strided_slice %5 {offsets = [0, 12], sizes = [16, 1], strides = [1, 1]} : vector<16x16xf32> to vector<16x1xf32>
    %102 = vector.extract_strided_slice %7 {offsets = [4, 0], sizes = [1, 16], strides = [1, 1]} : vector<8x16xf32> to vector<1x16xf32>
    %103 = vector.broadcast %101 : vector<16x1xf32> to vector<16x16xf32>
    %104 = vector.broadcast %102 : vector<1x16xf32> to vector<16x16xf32>
    %105 = arith.addf %103, %104 : vector<16x16xf32>
    %cst_28 = arith.constant 0.000000e+00 : f32
    %106 = vector.broadcast %cst_28 : f32 to vector<16x16xf32>
    %107 = arith.cmpf ogt, %105, %106 : vector<16x16xf32>
    %cst_29 = arith.constant 2.000000e-01 : f32
    %108 = vector.broadcast %cst_29 : f32 to vector<16x16xf32>
    %109 = arith.mulf %108, %105 : vector<16x16xf32>
    %110 = arith.select %107, %105, %109 : vector<16x16xi1>, vector<16x16xf32>
    %111 = arith.addf %110, %1 : vector<16x16xf32>
    %cst_30 = arith.constant dense<0xFF800000> : vector<16xf32>
    %112 = vector.multi_reduction <maximumf>, %111, %cst_30 [1] : vector<16x16xf32> to vector<16xf32>
    %113 = vector.shape_cast %112 : vector<16xf32> to vector<16x1xf32>
    %114 = vector.broadcast %113 : vector<16x1xf32> to vector<16x16xf32>
    %115 = arith.subf %111, %114 : vector<16x16xf32>
    %116 = math.exp %115 : vector<16x16xf32>
    %cst_31 = arith.constant dense<0.000000e+00> : vector<16xf32>
    %117 = vector.multi_reduction <add>, %116, %cst_31 [1] : vector<16x16xf32> to vector<16xf32>
    %118 = vector.shape_cast %117 : vector<16xf32> to vector<16x1xf32>
    %119 = tpu.reciprocal %118 : vector<16x1xf32> -> vector<16x1xf32>
    %120 = vector.broadcast %119 : vector<16x1xf32> to vector<16x16xf32>
    %121 = arith.mulf %116, %120 : vector<16x16xf32>
    %cst_32 = arith.constant dense<0.000000e+00> : vector<16x128xf32>
    %122 = tpu.matmul %121, %100, %cst_32 {dimension_numbers = #tpu.dot_dimension_numbers<[1], [0], [0], [1], [0, 0, 1, 1], [], []>} : vector<16x16xf32>, vector<16x128xf32>, vector<16x128xf32> -> vector<16x128xf32>
    %123 = vector.extract_strided_slice %3 {offsets = [0, 640], sizes = [16, 128], strides = [1, 1]} : vector<16x1024xf32> to vector<16x128xf32>
    %124 = vector.extract_strided_slice %5 {offsets = [0, 13], sizes = [16, 1], strides = [1, 1]} : vector<16x16xf32> to vector<16x1xf32>
    %125 = vector.extract_strided_slice %7 {offsets = [5, 0], sizes = [1, 16], strides = [1, 1]} : vector<8x16xf32> to vector<1x16xf32>
    %126 = vector.broadcast %124 : vector<16x1xf32> to vector<16x16xf32>
    %127 = vector.broadcast %125 : vector<1x16xf32> to vector<16x16xf32>
    %128 = arith.addf %126, %127 : vector<16x16xf32>
    %cst_33 = arith.constant 0.000000e+00 : f32
    %129 = vector.broadcast %cst_33 : f32 to vector<16x16xf32>
    %130 = arith.cmpf ogt, %128, %129 : vector<16x16xf32>
    %cst_34 = arith.constant 2.000000e-01 : f32
    %131 = vector.broadcast %cst_34 : f32 to vector<16x16xf32>
    %132 = arith.mulf %131, %128 : vector<16x16xf32>
    %133 = arith.select %130, %128, %132 : vector<16x16xi1>, vector<16x16xf32>
    %134 = arith.addf %133, %1 : vector<16x16xf32>
    %cst_35 = arith.constant dense<0xFF800000> : vector<16xf32>
    %135 = vector.multi_reduction <maximumf>, %134, %cst_35 [1] : vector<16x16xf32> to vector<16xf32>
    %136 = vector.shape_cast %135 : vector<16xf32> to vector<16x1xf32>
    %137 = vector.broadcast %136 : vector<16x1xf32> to vector<16x16xf32>
    %138 = arith.subf %134, %137 : vector<16x16xf32>
    %139 = math.exp %138 : vector<16x16xf32>
    %cst_36 = arith.constant dense<0.000000e+00> : vector<16xf32>
    %140 = vector.multi_reduction <add>, %139, %cst_36 [1] : vector<16x16xf32> to vector<16xf32>
    %141 = vector.shape_cast %140 : vector<16xf32> to vector<16x1xf32>
    %142 = tpu.reciprocal %141 : vector<16x1xf32> -> vector<16x1xf32>
    %143 = vector.broadcast %142 : vector<16x1xf32> to vector<16x16xf32>
    %144 = arith.mulf %139, %143 : vector<16x16xf32>
    %cst_37 = arith.constant dense<0.000000e+00> : vector<16x128xf32>
    %145 = tpu.matmul %144, %123, %cst_37 {dimension_numbers = #tpu.dot_dimension_numbers<[1], [0], [0], [1], [0, 0, 1, 1], [], []>} : vector<16x16xf32>, vector<16x128xf32>, vector<16x128xf32> -> vector<16x128xf32>
    %146 = vector.extract_strided_slice %3 {offsets = [0, 768], sizes = [16, 128], strides = [1, 1]} : vector<16x1024xf32> to vector<16x128xf32>
    %147 = vector.extract_strided_slice %5 {offsets = [0, 14], sizes = [16, 1], strides = [1, 1]} : vector<16x16xf32> to vector<16x1xf32>
    %148 = vector.extract_strided_slice %7 {offsets = [6, 0], sizes = [1, 16], strides = [1, 1]} : vector<8x16xf32> to vector<1x16xf32>
    %149 = vector.broadcast %147 : vector<16x1xf32> to vector<16x16xf32>
    %150 = vector.broadcast %148 : vector<1x16xf32> to vector<16x16xf32>
    %151 = arith.addf %149, %150 : vector<16x16xf32>
    %cst_38 = arith.constant 0.000000e+00 : f32
    %152 = vector.broadcast %cst_38 : f32 to vector<16x16xf32>
    %153 = arith.cmpf ogt, %151, %152 : vector<16x16xf32>
    %cst_39 = arith.constant 2.000000e-01 : f32
    %154 = vector.broadcast %cst_39 : f32 to vector<16x16xf32>
    %155 = arith.mulf %154, %151 : vector<16x16xf32>
    %156 = arith.select %153, %151, %155 : vector<16x16xi1>, vector<16x16xf32>
    %157 = arith.addf %156, %1 : vector<16x16xf32>
    %cst_40 = arith.constant dense<0xFF800000> : vector<16xf32>
    %158 = vector.multi_reduction <maximumf>, %157, %cst_40 [1] : vector<16x16xf32> to vector<16xf32>
    %159 = vector.shape_cast %158 : vector<16xf32> to vector<16x1xf32>
    %160 = vector.broadcast %159 : vector<16x1xf32> to vector<16x16xf32>
    %161 = arith.subf %157, %160 : vector<16x16xf32>
    %162 = math.exp %161 : vector<16x16xf32>
    %cst_41 = arith.constant dense<0.000000e+00> : vector<16xf32>
    %163 = vector.multi_reduction <add>, %162, %cst_41 [1] : vector<16x16xf32> to vector<16xf32>
    %164 = vector.shape_cast %163 : vector<16xf32> to vector<16x1xf32>
    %165 = tpu.reciprocal %164 : vector<16x1xf32> -> vector<16x1xf32>
    %166 = vector.broadcast %165 : vector<16x1xf32> to vector<16x16xf32>
    %167 = arith.mulf %162, %166 : vector<16x16xf32>
    %cst_42 = arith.constant dense<0.000000e+00> : vector<16x128xf32>
    %168 = tpu.matmul %167, %146, %cst_42 {dimension_numbers = #tpu.dot_dimension_numbers<[1], [0], [0], [1], [0, 0, 1, 1], [], []>} : vector<16x16xf32>, vector<16x128xf32>, vector<16x128xf32> -> vector<16x128xf32>
    %169 = vector.extract_strided_slice %3 {offsets = [0, 896], sizes = [16, 128], strides = [1, 1]} : vector<16x1024xf32> to vector<16x128xf32>
    %170 = vector.extract_strided_slice %5 {offsets = [0, 15], sizes = [16, 1], strides = [1, 1]} : vector<16x16xf32> to vector<16x1xf32>
    %171 = vector.extract_strided_slice %7 {offsets = [7, 0], sizes = [1, 16], strides = [1, 1]} : vector<8x16xf32> to vector<1x16xf32>
    %172 = vector.broadcast %170 : vector<16x1xf32> to vector<16x16xf32>
    %173 = vector.broadcast %171 : vector<1x16xf32> to vector<16x16xf32>
    %174 = arith.addf %172, %173 : vector<16x16xf32>
    %cst_43 = arith.constant 0.000000e+00 : f32
    %175 = vector.broadcast %cst_43 : f32 to vector<16x16xf32>
    %176 = arith.cmpf ogt, %174, %175 : vector<16x16xf32>
    %cst_44 = arith.constant 2.000000e-01 : f32
    %177 = vector.broadcast %cst_44 : f32 to vector<16x16xf32>
    %178 = arith.mulf %177, %174 : vector<16x16xf32>
    %179 = arith.select %176, %174, %178 : vector<16x16xi1>, vector<16x16xf32>
    %180 = arith.addf %179, %1 : vector<16x16xf32>
    %cst_45 = arith.constant dense<0xFF800000> : vector<16xf32>
    %181 = vector.multi_reduction <maximumf>, %180, %cst_45 [1] : vector<16x16xf32> to vector<16xf32>
    %182 = vector.shape_cast %181 : vector<16xf32> to vector<16x1xf32>
    %183 = vector.broadcast %182 : vector<16x1xf32> to vector<16x16xf32>
    %184 = arith.subf %180, %183 : vector<16x16xf32>
    %185 = math.exp %184 : vector<16x16xf32>
    %cst_46 = arith.constant dense<0.000000e+00> : vector<16xf32>
    %186 = vector.multi_reduction <add>, %185, %cst_46 [1] : vector<16x16xf32> to vector<16xf32>
    %187 = vector.shape_cast %186 : vector<16xf32> to vector<16x1xf32>
    %188 = tpu.reciprocal %187 : vector<16x1xf32> -> vector<16x1xf32>
    %189 = vector.broadcast %188 : vector<16x1xf32> to vector<16x16xf32>
    %190 = arith.mulf %185, %189 : vector<16x16xf32>
    %cst_47 = arith.constant dense<0.000000e+00> : vector<16x128xf32>
    %191 = tpu.matmul %190, %169, %cst_47 {dimension_numbers = #tpu.dot_dimension_numbers<[1], [0], [0], [1], [0, 0, 1, 1], [], []>} : vector<16x16xf32>, vector<16x128xf32>, vector<16x128xf32> -> vector<16x128xf32>
    %192 = tpu.concatenate %30, %53, %76, %99, %122, %145, %168, %191 in 1 : vector<16x128xf32>, vector<16x128xf32>, vector<16x128xf32>, vector<16x128xf32>, vector<16x128xf32>, vector<16x128xf32>, vector<16x128xf32>, vector<16x128xf32> -> vector<16x1024xf32>
    %c0_48 = arith.constant 0 : index
    %c0_49 = arith.constant 0 : index
    %193 = vector.load %arg5[%c0_48, %c0_49] : memref<1x1024xf32, #tpu.memory_space<vmem>>, vector<1x1024xf32>
    %194 = vector.broadcast %193 : vector<1x1024xf32> to vector<16x1024xf32>
    %195 = arith.addf %192, %194 : vector<16x1024xf32>
    %cst_50 = arith.constant 0.000000e+00 : f32
    %196 = vector.broadcast %cst_50 : f32 to vector<16x1024xf32>
    %197 = arith.cmpf ogt, %195, %196 : vector<16x1024xf32>
    %198 = math.exp %195 : vector<16x1024xf32>
    %cst_51 = arith.constant 1.000000e+00 : f32
    %199 = vector.broadcast %cst_51 : f32 to vector<16x1024xf32>
    %200 = arith.subf %198, %199 : vector<16x1024xf32>
    %201 = arith.select %197, %195, %200 : vector<16x1024xi1>, vector<16x1024xf32>
    %c0_52 = arith.constant 0 : index
    %c0_53 = arith.constant 0 : index
    %202 = vector.load %arg6[%c0_52, %c0_53] : memref<1024x128xf32, #tpu.memory_space<vmem>>, vector<1024x128xf32>
    %cst_54 = arith.constant dense<0.000000e+00> : vector<16x128xf32>
    %203 = tpu.matmul %201, %202, %cst_54 {dimension_numbers = #tpu.dot_dimension_numbers<[1], [0], [0], [1], [0, 0, 1, 1], [], []>} : vector<16x1024xf32>, vector<1024x128xf32>, vector<16x128xf32> -> vector<16x128xf32>
    %c0_55 = arith.constant 0 : index
    %c0_56 = arith.constant 0 : index
    %204 = vector.load %arg7[%c0_55, %c0_56] : memref<1024x2xf32, #tpu.memory_space<vmem>>, vector<1024x2xf32>
    %cst_57 = arith.constant dense<0.000000e+00> : vector<16x2xf32>
    %205 = tpu.matmul %201, %204, %cst_57 {dimension_numbers = #tpu.dot_dimension_numbers<[1], [0], [0], [1], [0, 0, 1, 1], [], []>} : vector<16x1024xf32>, vector<1024x2xf32>, vector<16x2xf32> -> vector<16x2xf32>
    %206 = vector.extract_strided_slice %205 {offsets = [0, 1], sizes = [16, 1], strides = [1, 1]} : vector<16x2xf32> to vector<16x1xf32>
    %207 = vector.extract_strided_slice %205 {offsets = [0, 0], sizes = [16, 1], strides = [1, 1]} : vector<16x2xf32> to vector<16x1xf32>
    %208 = tpu.transpose %207, [1, 0] : vector<16x1xf32> -> vector<1x16xf32>
    %209 = vector.broadcast %206 : vector<16x1xf32> to vector<16x16xf32>
    %210 = vector.broadcast %208 : vector<1x16xf32> to vector<16x16xf32>
    %211 = arith.addf %209, %210 : vector<16x16xf32>
    %cst_58 = arith.constant 0.000000e+00 : f32
    %212 = vector.broadcast %cst_58 : f32 to vector<16x16xf32>
    %213 = arith.cmpf ogt, %211, %212 : vector<16x16xf32>
    %cst_59 = arith.constant 2.000000e-01 : f32
    %214 = vector.broadcast %cst_59 : f32 to vector<16x16xf32>
    %215 = arith.mulf %214, %211 : vector<16x16xf32>
    %216 = arith.select %213, %211, %215 : vector<16x16xi1>, vector<16x16xf32>
    %217 = arith.addf %216, %1 : vector<16x16xf32>
    %cst_60 = arith.constant dense<0xFF800000> : vector<16xf32>
    %218 = vector.multi_reduction <maximumf>, %217, %cst_60 [1] : vector<16x16xf32> to vector<16xf32>
    %219 = vector.shape_cast %218 : vector<16xf32> to vector<16x1xf32>
    %220 = vector.broadcast %219 : vector<16x1xf32> to vector<16x16xf32>
    %221 = arith.subf %217, %220 : vector<16x16xf32>
    %222 = math.exp %221 : vector<16x16xf32>
    %cst_61 = arith.constant dense<0.000000e+00> : vector<16xf32>
    %223 = vector.multi_reduction <add>, %222, %cst_61 [1] : vector<16x16xf32> to vector<16xf32>
    %224 = vector.shape_cast %223 : vector<16xf32> to vector<16x1xf32>
    %225 = tpu.reciprocal %224 : vector<16x1xf32> -> vector<16x1xf32>
    %226 = vector.broadcast %225 : vector<16x1xf32> to vector<16x16xf32>
    %227 = arith.mulf %222, %226 : vector<16x16xf32>
    %cst_62 = arith.constant dense<0.000000e+00> : vector<16x128xf32>
    %228 = tpu.matmul %227, %203, %cst_62 {dimension_numbers = #tpu.dot_dimension_numbers<[1], [0], [0], [1], [0, 0, 1, 1], [], []>} : vector<16x16xf32>, vector<16x128xf32>, vector<16x128xf32> -> vector<16x128xf32>
    %c0_63 = arith.constant 0 : index
    %c0_64 = arith.constant 0 : index
    %229 = vector.load %arg8[%c0_63, %c0_64] : memref<1x128xf32, #tpu.memory_space<vmem>>, vector<1x128xf32>
    %230 = vector.broadcast %229 : vector<1x128xf32> to vector<16x128xf32>
    %231 = arith.addf %228, %230 : vector<16x128xf32>
    %cst_65 = arith.constant 0.000000e+00 : f32
    %232 = vector.broadcast %cst_65 : f32 to vector<16x128xf32>
    %233 = arith.cmpf ogt, %231, %232 : vector<16x128xf32>
    %234 = math.exp %231 : vector<16x128xf32>
    %cst_66 = arith.constant 1.000000e+00 : f32
    %235 = vector.broadcast %cst_66 : f32 to vector<16x128xf32>
    %236 = arith.subf %234, %235 : vector<16x128xf32>
    %237 = arith.select %233, %231, %236 : vector<16x128xi1>, vector<16x128xf32>
    %c0_67 = arith.constant 0 : index
    %c0_68 = arith.constant 0 : index
    %238 = vector.load %arg9[%c0_67, %c0_68] : memref<2x16xf32, #tpu.memory_space<vmem>>, vector<2x16xf32>
    %cst_69 = arith.constant dense<0.000000e+00> : vector<2x128xf32>
    %239 = tpu.matmul %238, %237, %cst_69 {dimension_numbers = #tpu.dot_dimension_numbers<[1], [0], [0], [1], [0, 0, 1, 1], [], []>} : vector<2x16xf32>, vector<16x128xf32>, vector<2x128xf32> -> vector<2x128xf32>
    %c0_70 = arith.constant 0 : index
    %c0_71 = arith.constant 0 : index
    %240 = vector.load %arg10[%c0_70, %c0_71] : memref<128x4xf32, #tpu.memory_space<vmem>>, vector<128x4xf32>
    %cst_72 = arith.constant dense<0.000000e+00> : vector<2x4xf32>
    %241 = tpu.matmul %239, %240, %cst_72 {dimension_numbers = #tpu.dot_dimension_numbers<[1], [0], [0], [1], [0, 0, 1, 1], [], []>} : vector<2x128xf32>, vector<128x4xf32>, vector<2x4xf32> -> vector<2x4xf32>
    %c0_73 = arith.constant 0 : index
    %c0_74 = arith.constant 0 : index
    %242 = vector.load %arg11[%c0_73, %c0_74] : memref<1x4xf32, #tpu.memory_space<vmem>>, vector<1x4xf32>
    %243 = vector.broadcast %242 : vector<1x4xf32> to vector<2x4xf32>
    %244 = arith.addf %241, %243 : vector<2x4xf32>
    %c0_75 = arith.constant 0 : index
    %c0_76 = arith.constant 0 : index
    %245 = vector.load %arg12[%c0_75, %c0_76] : memref<2x4xf32, #tpu.memory_space<vmem>>, vector<2x4xf32>
    tpu.vector_store %arg12[%c0_75, %c0_76], %244 {strides = array<i32>} : memref<2x4xf32, #tpu.memory_space<vmem>>, vector<2x4xf32>,
    return
  }
  func.func @transform_0(%arg0: i32) -> (i32, i32) {
    %c0_i32 = arith.constant 0 : i32
    %c0_i32_0 = arith.constant 0 : i32
    %c0_i32_1 = arith.constant 0 : i32
    return %c0_i32, %c0_i32_0 : i32, i32
  }
  func.func @transform_1(%arg0: i32) -> (i32, i32) {
    %c0_i32 = arith.constant 0 : i32
    %c0_i32_0 = arith.constant 0 : i32
    %c0_i32_1 = arith.constant 0 : i32
    return %c0_i32, %c0_i32_0 : i32, i32
  }
  func.func @transform_2(%arg0: i32) -> (i32, i32) {
    %c0_i32 = arith.constant 0 : i32
    %c0_i32_0 = arith.constant 0 : i32
    %c0_i32_1 = arith.constant 0 : i32
    return %c0_i32, %c0_i32_0 : i32, i32
  }
  func.func @transform_3(%arg0: i32) -> (i32, i32) {
    %c0_i32 = arith.constant 0 : i32
    %c0_i32_0 = arith.constant 0 : i32
    %c0_i32_1 = arith.constant 0 : i32
    return %c0_i32, %c0_i32_0 : i32, i32
  }
  func.func @transform_4(%arg0: i32) -> (i32, i32) {
    %c0_i32 = arith.constant 0 : i32
    %c0_i32_0 = arith.constant 0 : i32
    %c0_i32_1 = arith.constant 0 : i32
    return %c0_i32, %c0_i32_0 : i32, i32
  }
  func.func @transform_5(%arg0: i32) -> (i32, i32) {
    %c0_i32 = arith.constant 0 : i32
    %c0_i32_0 = arith.constant 0 : i32
    %c0_i32_1 = arith.constant 0 : i32
    return %c0_i32, %c0_i32_0 : i32, i32
  }
  func.func @transform_6(%arg0: i32) -> (i32, i32) {
    %c0_i32 = arith.constant 0 : i32
    %c0_i32_0 = arith.constant 0 : i32
    %c0_i32_1 = arith.constant 0 : i32
    return %c0_i32, %c0_i32_0 : i32, i32
  }
  func.func @transform_7(%arg0: i32) -> (i32, i32) {
    %c0_i32 = arith.constant 0 : i32
    %c0_i32_0 = arith.constant 0 : i32
    %c0_i32_1 = arith.constant 0 : i32
    return %c0_i32, %c0_i32_0 : i32, i32
  }
  func.func @transform_8(%arg0: i32) -> (i32, i32) {
    %c0_i32 = arith.constant 0 : i32
    %c0_i32_0 = arith.constant 0 : i32
    %c0_i32_1 = arith.constant 0 : i32
    return %c0_i32, %c0_i32_0 : i32, i32
  }
  func.func @transform_9(%arg0: i32) -> (i32, i32) {
    %c0_i32 = arith.constant 0 : i32
    %c0_i32_0 = arith.constant 0 : i32
    %c0_i32_1 = arith.constant 0 : i32
    return %c0_i32, %c0_i32_0 : i32, i32
  }
  func.func @transform_10(%arg0: i32) -> (i32, i32) {
    %c0_i32 = arith.constant 0 : i32
    %c0_i32_0 = arith.constant 0 : i32
    %c0_i32_1 = arith.constant 0 : i32
    return %c0_i32, %c0_i32_0 : i32, i32
  }
  func.func @transform_11(%arg0: i32) -> (i32, i32) {
    %c0_i32 = arith.constant 0 : i32
    %c0_i32_0 = arith.constant 0 : i32
    %c0_i32_1 = arith.constant 0 : i32
    return %c0_i32, %c0_i32_0 : i32, i32
  }
}

</mosaic_0001>

<bundles_post_ra>
// kernel: run.1
= control target key start
LH: loop header
LB: loop body
LE: loop exit
PB: predicated region body
PF: predicated region fallthrough
CT: control target
= control target key end

     0   :  { %vm59_vm0 = vcmask 130048   ;;  %s3970_s0 = inlined_call_operand.vmem [shape: f32[16,16], index: 0, kind: input, shape index: {}]   ;;  %s3971_s1 = inlined_call_operand.vmem [shape: f32[16,16], index: 1, kind: input, shape index: {}]   ;;  %s3972_s2 = inlined_call_operand.vmem [shape: f32[16,1024], index: 2, kind: input, shape index: {}]   ;;  %s3973_s3 = inlined_call_operand.vmem [shape: f32[16,16], index: 3, kind: input, shape index: {}]   ;;  %s3974_s4 = inlined_call_operand.vmem [shape: f32[1,1024], index: 4, kind: input, shape index: {}]   ;;  %s3975_s5 = inlined_call_operand.vmem [shape: f32[1024,128], index: 5, kind: input, shape index: {}]   ;;  %s3976_s6 = inlined_call_operand.vmem [shape: f32[1024,2], index: 6, kind: input, shape index: {}]   ;;  %s3977_s7 = inlined_call_operand.vmem [shape: f32[1,128], index: 7, kind: input, shape index: {}]   ;;  %s3978_s8 = inlined_call_operand.vmem [shape: f32[2,16], index: 8, kind: input, shape index: {}]   ;;  %s3979_s9 = inlined_call_operand.vmem [shape: f32[128,4], index: 9, kind: input, shape index: {}]   ;;  %s3980_s10 = inlined_call_operand.vmem [shape: f32[1,4], index: 10, kind: input, shape index: {}]   ;;  %s3981_s11 = inlined_call_operand.hbm [shape: f32[2,4], index: 11, kind: output, shape index: {}]  }
   0x1   :  { %v51_v0 = vld [vmem:[%s3972_s2 + $0x40] sm:$0xff] }
   0x2   :  { %v43_v1 = vld [vmem:[%s3972_s2] sm:$0xff]  ;;  %80 = vmatpush.msra.mxu0 %v51_v0 }
   0x3   :  { %v2344_v2 = vld [vmem:[%s3970_s0] sm:$0xff] }
   0x4   :  { %v55_v3 = vld [vmem:[%s3972_s2 + $0x60] sm:$0xff]  ;;  %81 = vmatpush.msra.mxu0 %v43_v1 }
   0x5   :  { %16 = vsyncpa [#allocation3], 0  ;;  %2041 = vmatmul.msk.f32.vlgmr.msra.gmra.mxu0 %vm59_vm0, %v2344_v2  ;;  %v47_v4 = vld [vmem:[%s3972_s2 + $0x20] sm:$0xff]  ;;  %v251_v5 = vld [vmem:[%s3973_s3 + $0x8] sm:$0xff]  ;;  %v2265_v12 = vmov 11   ;;  %v2266_v13 = vmov 9  }
   0x6   :  { %172 = vmatpush.msrb.mxu0 %v55_v3  ;;  %v250_v6 = vld [vmem:[%s3973_s3] sm:$0xff]  ;;  %v2363_v7 = vld [vmem:[%s3970_s0 + $0x8] sm:$0xff]  ;;  %2112 = vset.pattern.permute.xlu2 %v2265_v12  ;;  %v2267_v14 = vmov 8   ;;  %v2268_v20 = vmov 15   ;;  %v2269_v21 = vmov 13   ;;  %v2270_v22 = vmov 10  }
   0x7   :  { %v52_v8 = vld [vmem:[%s3972_s2 + $0x48] sm:$0xff]  ;;  %2109 = vset.pattern.permute.xlu0 %v2266_v13  ;;  %2111 = vset.pattern.permute.xlu1 %v2267_v14  ;;  %v2271_v24 = vmov 14   ;;  %v2272_v25 = vmov 12   ;;  %v2408_v43 = vld [vmem:[%s3971_s1] sm:$0xff]  ;;  %s2274_s15 = smov [#allocation2]   ;;  %s2032_s18 = sshll.u32 %s3981_s11, 4  ;;  %s2033_s18 = int_to_ptr.hbm [resolvable:$true] %s2032_s18 }
   0x8   :  { %173 = vmatpush.msrb.mxu0 %v47_v4  ;;  %v44_v9 = vld [vmem:[%s3972_s2 + $0x8] sm:$0xff]  ;;  %103 = vmatpush.msra.mxu1 %v52_v8  ;;  %s2030_s16 = sshll.u32 %s2274_s15, 4  ;;  %s2031_s16 = int_to_ptr.vmem [resolvable:$true] %s2030_s16 }
   0x9   :  { %v56_v10 = vld [vmem:[%s3972_s2 + $0x68] sm:$0xff] }
   0xa   :  { %266 = vmatpush.msra.mxu0 %v251_v5  ;;  %104 = vmatpush.msra.mxu1 %v44_v9  ;;  %v48_v11 = vld [vmem:[%s3972_s2 + $0x28] sm:$0xff] }
   0xb   :  { %2043 = vmatmul.msk.f32.vlgmr.msra.gmra.mxu1 %vm59_vm0, %v2344_v2  ;;  %v2413_v44 = vld [vmem:[%s3971_s1 + $0x8] sm:$0xff] }
   0xc   :  { %267 = vmatpush.msra.mxu0 %v250_v6  ;;  %195 = vmatpush.msrb.mxu1 %v56_v10 }
   0xd   :  { %2042 = vmatmul.msk.f32.gmra.mxu0 %vm59_vm0, %v2363_v7 }
   0xe   :  { %196 = vmatpush.msrb.mxu1 %v48_v11 }
  0x13   :  { %2044 = vmatmul.msk.f32.gmra.mxu1 %vm59_vm0, %v2363_v7 }
  0x15   :  { %2049 = vmatmul.msk.f32.vlgmr.msrb.gmra.mxu0 %vm59_vm0, %v2344_v2 }
  0x1b   :  { %2051 = vmatmul.msk.f32.vlgmr.msrb.gmra.mxu1 %vm59_vm0, %v2344_v2 }
  0x1d   :  { %2050 = vmatmul.msk.f32.gmra.mxu0 %vm59_vm0, %v2363_v7 }
  0x23   :  { %2052 = vmatmul.msk.f32.gmra.mxu1 %vm59_vm0, %v2363_v7 }
  0x25   :  { %2057 = vmatmul.msk.f32.vlgmr.msra.gmra.mxu0 %vm59_vm0, %v2344_v2 }
  0x2d   :  { %2058 = vmatmul.msk.f32.gmra.mxu0 %vm59_vm0, %v2363_v7 }
  0x82   :  { %v83_v15 = vpop.f32.mrf.mxu0 }
  0x8a   :  { %v86_v16 = vpop.f32.mrf.mxu0 }
  0x8b   :  { %396 = vmatpush.msra.mxu1 %v86_v16 }
  0x8d   :  { %397 = vmatpush.msra.mxu1 %v83_v15 }
  0x92   :  { %v175_v17 = vpop.f32.mrf.mxu0 }
  0x9a   :  { %v178_v18 = vpop.f32.mrf.mxu0 }
  0x9b   :  { %780 = vmatpush.msrb.mxu1 %v178_v18 }
  0x9d   :  { %781 = vmatpush.msrb.mxu1 %v175_v17 }
  0xa2   :  { %v269_v19 = vpop.f32.mrf.mxu0 }
  0xa3   :  { %598 = vperm.xlu2 %2112, %v269_v19   ;;  %309 = vperm.xlu1 %2111, %v269_v19  }
  0xa4   :  { %406 = vperm.xlu0 %2109, %v269_v19  }
  0xaa   :  { %v272_v23 = vpop.f32.mrf.mxu0 }
  0xab   :  { %2116 = vset.pattern.permute.xlu2 %v2268_v20  ;;  %2113 = vset.pattern.permute.xlu1 %v2269_v21 }
  0xac   :  { %2110 = vset.pattern.permute.xlu0 %v2270_v22  ;;  %982 = vperm.xlu2 %2116, %v269_v19  }
  0xad   :  { %790 = vperm.xlu1 %2113, %v269_v19   ;;  %502 = vperm.xlu0 %2110, %v269_v19  }
  0xb4   :  { %2118 = vset.pattern.permute.xlu2 %v2270_v22 }
  0xb5   :  { %2117 = vset.pattern.permute.xlu1 %v2266_v13  ;;  %2114 = vset.pattern.permute.xlu0 %v2271_v24 }
  0xb6   :  { %886 = vperm.xlu0 %2114, %v269_v19   ;;  %506 = vperm.xlu2 %2118, %v272_v23  }
  0xb7   :  { %410 = vperm.xlu1 %2117, %v272_v23  }
  0xbe   :  { %2115 = vset.pattern.permute.xlu0 %v2272_v25  ;;  %2119 = vset.pattern.permute.xlu2 %v2267_v14 }
  0xbf   :  { %694 = vperm.xlu0 %2115, %v269_v19   ;;  %314 = vperm.xlu2 %2119, %v272_v23  }
  0xc7   :  { %698 = vperm.xlu0 %2115, %v272_v23   ;;  %2120 = vset.pattern.permute.xlu2 %v2265_v12 }
  0xc8   :  { %602 = vperm.xlu2 %2120, %v272_v23  }
  0xd0   :  { %2121 = vset.pattern.permute.xlu2 %v2269_v21 }
  0xd1   :  { %794 = vperm.xlu2 %2121, %v272_v23  }
  0xd9   :  { %2122 = vset.pattern.permute.xlu2 %v2271_v24 }
  0xda   :  { %890 = vperm.xlu2 %2122, %v272_v23  }
  0xe2   :  { %2123 = vset.pattern.permute.xlu2 %v2268_v20 }
  0xe3   :  { %986 = vperm.xlu2 %2123, %v272_v23  }
  0xec   :  { %275 = vxpose.xlu1.b32.start [1/2] (short) (narrow) %v269_v19, 8 }
  0xf4   :  { %276 = vxpose.xlu1.b32.end [2/2] (short) (narrow) %v272_v23, 8 }
  0xfd   :  { %v599_v27 = vpop.permute.xlu2 %598 }
 0x106   :  { %v2395_v29 = vpop.permute.xlu2 %982 }
 0x110   :  { %v507_v32 = vpop.permute.xlu2 %506 }
 0x115   :  { %v310_v26 = vpop.permute.xlu1 %309 }
 0x116   :  { %v407_v30 = vpop.permute.xlu0 %406 }
 0x119   :  { %v315_v46 = vpop.permute.xlu2 %314 }
 0x11f   :  { %v791_v28 = vpop.permute.xlu1 %790  ;;  %v503_v33 = vpop.permute.xlu0 %502 }
 0x122   :  { %v603_v6 = vpop.permute.xlu2 %602 }
 0x128   :  { %v887_v56 = vpop.permute.xlu0 %886 }
 0x129   :  { %v411_v31 = vpop.permute.xlu1 %410 }
 0x12b   :  { %v795_v23 = vpop.permute.xlu2 %794 }
 0x131   :  { %v695_v12 = vpop.permute.xlu0 %694 }
 0x190   :  { %v2397_v34 = vpop.trf.xlu1 }
 0x191   :  { %v509_v35 = vperm.slane %v2397_v34, 2  ;;  %v413_v36 = vperm.slane %v2397_v34, 1  ;;  %v797_v37 = vperm.slane %v2397_v34, 5  ;;  %v317_v38 = vperm.slane %v2397_v34, 0 }
 0x192   :  { %v893_v50 = vperm.slane %v2397_v34, 6  ;;  %v605_v51 = vperm.slane %v2397_v34, 3  ;;  %v701_v10 = vperm.slane %v2397_v34, 4 }
 0x193   :  { %v510_v39 = vadd.f32 %v509_v35, %v503_v33  ;;  %v415_v40 = vadd.f32 %v413_v36, %v411_v31  ;;  %v414_v41 = vadd.f32 %v413_v36, %v407_v30  ;;  %v798_v42 = vadd.f32 %v797_v37, %v791_v28 }
 0x194   :  { %v318_v45 = vadd.f32 %v317_v38, %v310_v26  ;;  %v606_v1 = vadd.f32 %v605_v51, %v599_v27  ;;  %v894_v4 = vadd.f32 %v893_v50, %v887_v56  ;;  %v702_v16 = vadd.f32 %v701_v10, %v695_v12 }
 0x195   :  { %vm512_vm1 = vcmp.gt.f32.partialorder %v510_v39, 0.0  ;;  %v514_v47 = vmul.f32 0.2, %v510_v39  ;;  %vm417_vm2 = vcmp.gt.f32.partialorder %v415_v40, 0.0  ;;  %v419_v48 = vmul.f32 0.2, %v415_v40 }
 0x196   :  { %vm416_vm3 = vcmp.gt.f32.partialorder %v414_v41, 0.0  ;;  %v418_v49 = vmul.f32 0.2, %v414_v41  ;;  %v802_v54 = vmul.f32 0.2, %v798_v42  ;;  %vm320_vm4 = vcmp.gt.f32.partialorder %v318_v45, 0.0 }
 0x197   :  { %v516_v52 = vsel %vm512_vm1, %v510_v39, %v514_v47  ;;  %v421_v53 = vsel %vm417_vm2, %v415_v40, %v419_v48  ;;  %v322_v55 = vmul.f32 0.2, %v318_v45  ;;  %vm800_vm5 = vcmp.gt.f32.partialorder %v798_v42, 0.0  ;;  %v891_v39 = vpop.permute.xlu2 %890 }
 0x198   :  { %v2420_v57 = vadd.f32 %v516_v52, %v2408_v43  ;;  %v2423_v58 = vadd.f32 %v421_v53, %v2413_v44  ;;  %v420_v59 = vsel %vm416_vm3, %v414_v41, %v418_v49  ;;  %v804_v3 = vsel %vm800_vm5, %v798_v42, %v802_v54  ;;  %v699_v52 = vpop.permute.xlu0 %698 }
 0x199   :  { %v2426_v60 = vadd.f32 %v420_v59, %v2408_v43  ;;  %v324_v0 = vsel %vm320_vm4, %v318_v45, %v322_v55  ;;  %v2442_v8 = vadd.f32 %v804_v3, %v2408_v43  ;;  %v610_v9 = vmul.f32 0.2, %v606_v1 }
 0x19a   :  { %v520_v61 = vsel %vm59_vm0, %v2420_v57, -inf  ;;  %v427_v62 = vsel %vm59_vm0, %v2423_v58, -inf  ;;  %v2439_v5 = vadd.f32 %v324_v0, %v2408_v43  ;;  %v898_v11 = vmul.f32 0.2, %v894_v4 }
 0x19b   :  { %521 = vmax.xlane.f32.xlu2 %v520_v61  ;;  %428 = vmax.xlane.f32.xlu1 %v427_v62  ;;  %v424_v63 = vsel %vm59_vm0, %v2426_v60, -inf  ;;  %vm608_vm6 = vcmp.gt.f32.partialorder %v606_v1, 0.0  ;;  %vm896_vm7 = vcmp.gt.f32.partialorder %v894_v4, 0.0  ;;  %v808_v14 = vsel %vm59_vm0, %v2442_v8, -inf }
 0x19c   :  { %425 = vmax.xlane.f32.xlu0 %v424_v63  ;;  %v328_v13 = vsel %vm59_vm0, %v2439_v5, -inf  ;;  %v612_v15 = vsel %vm608_vm6, %v606_v1, %v610_v9  ;;  %v900_v17 = vsel %vm896_vm7, %v894_v4, %v898_v11  ;;  %v511_v18 = vadd.f32 %v509_v35, %v507_v32 }
 0x19d   :  { %v2450_v19 = vadd.f32 %v612_v15, %v2408_v43  ;;  %v2453_v20 = vadd.f32 %v900_v17, %v2408_v43  ;;  %v706_v21 = vmul.f32 0.2, %v702_v16  ;;  %vm704_vm8 = vcmp.gt.f32.partialorder %v702_v16, 0.0  ;;  %v53_v15 = vld [vmem:[%s3972_s2 + $0x50] sm:$0xff]  ;;  %v46_v17 = vld [vmem:[%s3972_s2 + $0x18] sm:$0xff] }
 0x19e   :  { %v515_v22 = vmul.f32 0.2, %v511_v18  ;;  %vm513_vm9 = vcmp.gt.f32.partialorder %v511_v18, 0.0  ;;  %v319_v27 = vadd.f32 %v317_v38, %v315_v46  ;;  %v799_v30 = vadd.f32 %v797_v37, %v795_v23  ;;  %126 = vmatpush.msra.mxu2 %v53_v15 }
 0x19f   :  { %v616_v24 = vsel %vm59_vm0, %v2450_v19, -inf  ;;  %v904_v25 = vsel %vm59_vm0, %v2453_v20, -inf  ;;  %v708_v26 = vsel %vm704_vm8, %v702_v16, %v706_v21  ;;  %v607_v37 = vadd.f32 %v605_v51, %v603_v6  ;;  %v987_v63 = vpop.permute.xlu2 %986  ;;  %v45_v16 = vld [vmem:[%s3972_s2 + $0x10] sm:$0xff] }
 0x1a0   :  { %v517_v28 = vsel %vm513_vm9, %v511_v18, %v515_v22  ;;  %v2464_v31 = vadd.f32 %v708_v26, %v2408_v43  ;;  %v323_v33 = vmul.f32 0.2, %v319_v27  ;;  %v803_v35 = vmul.f32 0.2, %v799_v30  ;;  %127 = vmatpush.msra.mxu2 %v45_v16  ;;  %v57_v18 = vld [vmem:[%s3972_s2 + $0x70] sm:$0xff] }
 0x1a1   :  { %v2467_v32 = vadd.f32 %v517_v28, %v2413_v44  ;;  %vm321_vm10 = vcmp.gt.f32.partialorder %v319_v27, 0.0  ;;  %vm801_vm11 = vcmp.gt.f32.partialorder %v799_v30, 0.0  ;;  %v895_v42 = vadd.f32 %v893_v50, %v891_v39  ;;  %2045 = vmatmul.msk.f32.vlgmr.msra.gmra.mxu2 %vm59_vm0, %v2344_v2 }
 0x1a2   :  { %v712_v36 = vsel %vm59_vm0, %v2464_v31, -inf  ;;  %v325_v40 = vsel %vm321_vm10, %v319_v27, %v323_v33  ;;  %v805_v41 = vsel %vm801_vm11, %v799_v30, %v803_v35  ;;  %v611_v47 = vmul.f32 0.2, %v607_v37  ;;  %v49_v27 = vld [vmem:[%s3972_s2 + $0x30] sm:$0xff] }
 0x1a3   :  { %329 = vmax.xlane.f32.xlu2 %v328_v13  ;;  %v523_v38 = vsel %vm59_vm0, %v2467_v32, -inf  ;;  %v2478_v45 = vadd.f32 %v325_v40, %v2413_v44  ;;  %v2481_v46 = vadd.f32 %v805_v41, %v2413_v44  ;;  %v989_v48 = vperm.slane %v2397_v34, 7 }
 0x1a4   :  { %809 = vmax.xlane.f32.xlu0 %v808_v14  ;;  %v899_v49 = vmul.f32 0.2, %v895_v42  ;;  %vm609_vm12 = vcmp.gt.f32.partialorder %v607_v37, 0.0  ;;  %vm897_vm13 = vcmp.gt.f32.partialorder %v895_v42, 0.0  ;;  %v703_v56 = vadd.f32 %v701_v10, %v699_v52 }
 0x1a5   :  { %v331_v51 = vsel %vm59_vm0, %v2478_v45, -inf  ;;  %v811_v53 = vsel %vm59_vm0, %v2481_v46, -inf  ;;  %v613_v50 = vsel %vm609_vm12, %v607_v37, %v611_v47  ;;  %v990_v54 = vadd.f32 %v989_v48, %v2395_v29 }
 0x1a6   :  { %v901_v55 = vsel %vm897_vm13, %v895_v42, %v899_v49  ;;  %v2490_v59 = vadd.f32 %v613_v50, %v2413_v44  ;;  %v707_v62 = vmul.f32 0.2, %v703_v56  ;;  %vm705_vm15 = vcmp.gt.f32.partialorder %v703_v56, 0.0 }
 0x1a7   :  { %v2493_v34 = vadd.f32 %v901_v55, %v2413_v44  ;;  %v994_v61 = vmul.f32 0.2, %v990_v54  ;;  %vm992_vm14 = vcmp.gt.f32.partialorder %v990_v54, 0.0  ;;  %v991_v3 = vadd.f32 %v989_v48, %v987_v63 }
 0x1a8   :  { %v619_v0 = vsel %vm59_vm0, %v2490_v59, -inf  ;;  %v709_v4 = vsel %vm705_vm15, %v703_v56, %v707_v62 }
 0x1a9   :  { %v907_v29 = vsel %vm59_vm0, %v2493_v34, -inf  ;;  %v996_v1 = vsel %vm992_vm14, %v990_v54, %v994_v61  ;;  %v2503_v9 = vadd.f32 %v709_v4, %v2413_v44  ;;  %v995_v10 = vmul.f32 0.2, %v991_v3  ;;  %2046 = vmatmul.msk.f32.gmra.mxu2 %vm59_vm0, %v2363_v7 }
 0x1aa   :  { %v2500_v6 = vadd.f32 %v996_v1, %v2408_v43  ;;  %vm993_vm1 = vcmp.gt.f32.partialorder %v991_v3, 0.0 }
 0x1ab   :  { %617 = vmax.xlane.f32.xlu2 %v616_v24  ;;  %v715_v12 = vsel %vm59_vm0, %v2503_v9, -inf  ;;  %v997_v13 = vsel %vm993_vm1, %v991_v3, %v995_v10 }
 0x1ac   :  { %905 = vmax.xlane.f32.xlu0 %v904_v25  ;;  %v1000_v11 = vsel %vm59_vm0, %v2500_v6, -inf  ;;  %v2510_v14 = vadd.f32 %v997_v13, %v2413_v44  ;;  %v54_v44 = vld [vmem:[%s3972_s2 + $0x58] sm:$0xff] }
 0x1ad   :  { %149 = vmatpush.msrb.mxu2 %v54_v44  ;;  %2096 = vmatpush.msra.mxu3 %v54_v44 }
 0x1ae   :  { %v1003_v43 = vsel %vm59_vm0, %v2510_v14, -inf }
 0x1af   :  { %150 = vmatpush.msrb.mxu2 %v46_v17  ;;  %2097 = vmatpush.msra.mxu3 %v46_v17 }
 0x1b0   :  { %2048 = vmatmul.msk.f32.vlgmr.msra.gmra.mxu3 %vm59_vm0, %v2363_v7 }
 0x1b1   :  { %2047 = vmatmul.msk.f32.vlgmr.msrb.gmra.mxu2 %vm59_vm0, %v2344_v2 }
 0x1b2   :  { %218 = vmatpush.msra.mxu2 %v57_v18 }
 0x1b3   :  { %713 = vmax.xlane.f32.xlu2 %v712_v36 }
 0x1b4   :  { %524 = vmax.xlane.f32.xlu0 %v523_v38  ;;  %219 = vmatpush.msra.mxu2 %v49_v27 }
 0x1b9   :  { %2053 = vmatmul.msk.f32.vlgmr.msra.gmra.mxu2 %vm59_vm0, %v2344_v2 }
 0x1bb   :  { %332 = vmax.xlane.f32.xlu2 %v331_v51 }
 0x1bc   :  { %812 = vmax.xlane.f32.xlu0 %v811_v53 }
 0x1c1   :  { %2054 = vmatmul.msk.f32.gmra.mxu2 %vm59_vm0, %v2363_v7 }
 0x1c3   :  { %620 = vmax.xlane.f32.xlu2 %v619_v0 }
 0x1c4   :  { %908 = vmax.xlane.f32.xlu0 %v907_v29 }
 0x1cb   :  { %1001 = vmax.xlane.f32.xlu2 %v1000_v11 }
 0x1cc   :  { %716 = vmax.xlane.f32.xlu0 %v715_v12 }
 0x1d3   :  { %1004 = vmax.xlane.f32.xlu2 %v1003_v43 }
 0x20e   :  { %v522_v21 = vpop.xlane.xlu2 %521  ;;  %v429_v30 = vpop.xlane.xlu1 %428 }
 0x20f   :  { %v526_v22 = vsub.f32 %v2420_v57, %v522_v21  ;;  %v426_v23 = vpop.xlane.xlu0 %425  ;;  %v431_v39 = vsub.f32 %v2423_v58, %v429_v30  ;;  %v50_v58 = vld [vmem:[%s3972_s2 + $0x38] sm:$0xff] }
 0x210   :  { %v430_v24 = vsub.f32 %v2426_v60, %v426_v23 }
 0x211   :  { %v528_v25 = vmul.f32 1.442695, %v526_v22 }
 0x212   :  { %v432_v26 = vmul.f32 1.442695, %v430_v24 }
 0x213   :  { %2129 = vpow2.f32 %v528_v25 }
 0x214   :  { %2131 = vpow2.f32 %v432_v26 }
 0x216   :  { %v330_v28 = vpop.xlane.xlu2 %329 }
 0x217   :  { %v810_v33 = vpop.xlane.xlu0 %809  ;;  %v334_v57 = vsub.f32 %v2439_v5, %v330_v28  ;;  %v58_v5 = vld [vmem:[%s3972_s2 + $0x78] sm:$0xff] }
 0x218   :  { %v814_v35 = vsub.f32 %v2442_v8, %v810_v33  ;;  %241 = vmatpush.msrb.mxu3 %v58_v5  ;;  %v434_v8 = vmul.f32 1.442695, %v431_v39 }
 0x219   :  { %v2546_v60 = vpop.eup %2129  ;;  %v336_v36 = vmul.f32 1.442695, %v334_v57 }
 0x21a   :  { %v816_v38 = vmul.f32 1.442695, %v814_v35  ;;  %v532_v40 = vsel %vm59_vm0, %v2546_v60, 0.0  ;;  %v2551_v37 = vpop.eup %2131  ;;  %242 = vmatpush.msrb.mxu3 %v50_v58 }
 0x21b   :  { %2133 = vpow2.f32 %v336_v36  ;;  %533 = vadd.xlane.f32.xlu2 %v532_v40  ;;  %v436_v41 = vsel %vm59_vm0, %v2551_v37, 0.0  ;;  %2055 = vmatmul.msk.f32.vlgmr.msrb.gmra.mxu3 %vm59_vm0, %v2344_v2 }
 0x21c   :  { %2135 = vpow2.f32 %v816_v38  ;;  %437 = vadd.xlane.f32.xlu0 %v436_v41 }
 0x21d   :  { %2137 = vpow2.f32 %v434_v8  ;;  %v106_v8 = vpop.f32.mrf.mxu1 }
 0x21e   :  { %v618_v42 = vpop.xlane.xlu2 %617 }
 0x21f   :  { %v906_v47 = vpop.xlane.xlu0 %905  ;;  %v622_v48 = vsub.f32 %v2450_v19, %v618_v42 }
 0x220   :  { %v910_v51 = vsub.f32 %v2453_v20, %v906_v47 }
 0x221   :  { %v2566_v49 = vpop.eup %2133  ;;  %v624_v52 = vmul.f32 1.442695, %v622_v48 }
 0x222   :  { %v2569_v53 = vpop.eup %2135  ;;  %v340_v50 = vsel %vm59_vm0, %v2566_v49, 0.0  ;;  %v912_v19 = vmul.f32 1.442695, %v910_v51 }
 0x223   :  { %2139 = vpow2.f32 %v624_v52  ;;  %v820_v54 = vsel %vm59_vm0, %v2569_v53, 0.0  ;;  %341 = vadd.xlane.f32.xlu2 %v340_v50  ;;  %v2575_v56 = vpop.eup %2137  ;;  %2056 = vmatmul.msk.f32.gmra.mxu3 %vm59_vm0, %v2363_v7 }
 0x224   :  { %821 = vadd.xlane.f32.xlu0 %v820_v54  ;;  %2141 = vpow2.f32 %v912_v19  ;;  %v439_v29 = vsel %vm59_vm0, %v2575_v56, 0.0  ;;  %v129_v42 = vpop.f32.mrf.mxu2 }
 0x225   :  { %v109_v47 = vpop.f32.mrf.mxu1 }
 0x226   :  { %v714_v55 = vpop.xlane.xlu2 %713  ;;  %492 = vmatpush.msrb.mxu2 %v109_v47 }
 0x227   :  { %v525_v2 = vpop.xlane.xlu0 %524  ;;  %v718_v62 = vsub.f32 %v2464_v31, %v714_v55 }
 0x228   :  { %v527_v20 = vsub.f32 %v2467_v32, %v525_v2  ;;  %493 = vmatpush.msrb.mxu2 %v106_v8 }
 0x229   :  { %v2580_v61 = vpop.eup %2139  ;;  %v720_v1 = vmul.f32 1.442695, %v718_v62 }
 0x22a   :  { %v530_v63 = vmul.f32 1.442695, %v527_v20  ;;  %v628_v0 = vsel %vm59_vm0, %v2580_v61, 0.0  ;;  %v2587_v3 = vpop.eup %2141 }
 0x22b   :  { %629 = vadd.xlane.f32.xlu2 %v628_v0  ;;  %v916_v12 = vsel %vm59_vm0, %v2587_v3, 0.0 }
 0x22c   :  { %2143 = vpow2.f32 %v530_v63  ;;  %440 = vadd.xlane.f32.xlu0 %v439_v29  ;;  %v132_v48 = vpop.f32.mrf.mxu2 }
 0x22d   :  { %2145 = vpow2.f32 %v720_v1  ;;  %588 = vmatpush.msra.mxu3 %v132_v48  ;;  %v198_v29 = vpop.f32.mrf.mxu1 }
 0x22e   :  { %v333_v32 = vpop.xlane.xlu2 %332 }
 0x22f   :  { %v813_v7 = vpop.xlane.xlu0 %812  ;;  %v335_v4 = vsub.f32 %v2478_v45, %v333_v32  ;;  %589 = vmatpush.msra.mxu3 %v129_v42 }
 0x230   :  { %v815_v31 = vsub.f32 %v2481_v46, %v813_v7 }
 0x231   :  { %v338_v10 = vmul.f32 1.442695, %v335_v4 }
 0x232   :  { %v2591_v11 = vpop.eup %2143  ;;  %v818_v43 = vmul.f32 1.442695, %v815_v31 }
 0x233   :  { %2147 = vpow2.f32 %v338_v10  ;;  %v535_v13 = vsel %vm59_vm0, %v2591_v11, 0.0  ;;  %917 = vadd.xlane.f32.xlu2 %v916_v12  ;;  %v2597_v16 = vpop.eup %2145  ;;  %v155_v20 = vpop.f32.mrf.mxu3 }
 0x234   :  { %536 = vadd.xlane.f32.xlu0 %v535_v13  ;;  %2149 = vpow2.f32 %v818_v43  ;;  %v724_v21 = vsel %vm59_vm0, %v2597_v16, 0.0  ;;  %v152_v2 = vpop.f32.mrf.mxu2  ;;  %684 = vmatpush.msrb.mxu0 %v155_v20 }
 0x236   :  { %v621_v15 = vpop.xlane.xlu2 %620  ;;  %685 = vmatpush.msrb.mxu0 %v152_v2 }
 0x237   :  { %v909_v45 = vpop.xlane.xlu0 %908  ;;  %v623_v44 = vsub.f32 %v2490_v59, %v621_v15 }
 0x238   :  { %v911_v17 = vsub.f32 %v2493_v34, %v909_v45 }
 0x239   :  { %v2600_v46 = vpop.eup %2147  ;;  %v626_v18 = vmul.f32 1.442695, %v623_v44 }
 0x23a   :  { %v343_v22 = vsel %vm59_vm0, %v2600_v46, 0.0  ;;  %v914_v23 = vmul.f32 1.442695, %v911_v17  ;;  %v2607_v25 = vpop.eup %2149 }
 0x23b   :  { %2151 = vpow2.f32 %v626_v18  ;;  %725 = vadd.xlane.f32.xlu2 %v724_v21  ;;  %344 = vadd.xlane.f32.xlu1 %v343_v22  ;;  %v823_v33 = vsel %vm59_vm0, %v2607_v25, 0.0 }
 0x23c   :  { %2153 = vpow2.f32 %v914_v23 }
 0x23e   :  { %v1002_v24 = vpop.xlane.xlu2 %1001 }
 0x23f   :  { %v717_v59 = vpop.xlane.xlu0 %716  ;;  %v1006_v26 = vsub.f32 %v2500_v6, %v1002_v24 }
 0x240   :  { %v719_v27 = vsub.f32 %v2503_v9, %v717_v59 }
 0x241   :  { %v2611_v34 = vpop.eup %2151  ;;  %v1008_v28 = vmul.f32 1.442695, %v1006_v26 }
 0x242   :  { %v722_v30 = vmul.f32 1.442695, %v719_v27  ;;  %v631_v57 = vsel %vm59_vm0, %v2611_v34, 0.0  ;;  %v2617_v36 = vpop.eup %2153  ;;  %v221_v27 = vpop.f32.mrf.mxu2 }
 0x243   :  { %2155 = vpow2.f32 %v1008_v28  ;;  %824 = vadd.xlane.f32.xlu1 %v823_v33  ;;  %632 = vadd.xlane.f32.xlu0 %v631_v57  ;;  %v919_v40 = vsel %vm59_vm0, %v2617_v36, 0.0  ;;  %v201_v33 = vpop.f32.mrf.mxu1 }
 0x244   :  { %2157 = vpow2.f32 %v722_v30  ;;  %876 = vmatpush.msra.mxu2 %v201_v33 }
 0x246   :  { %v1005_v35 = vpop.xlane.xlu2 %1004  ;;  %877 = vmatpush.msra.mxu2 %v198_v29 }
 0x247   :  { %v1007_v6 = vsub.f32 %v2510_v14, %v1005_v35 }
 0x249   :  { %v2620_v9 = vpop.eup %2155  ;;  %v1010_v39 = vmul.f32 1.442695, %v1007_v6 }
 0x24a   :  { %v2622_v38 = vpop.eup %2157  ;;  %v1012_v41 = vsel %vm59_vm0, %v2620_v9, 0.0 }
 0x24b   :  { %2159 = vpow2.f32 %v1010_v39  ;;  %v727_v5 = vsel %vm59_vm0, %v2622_v38, 0.0  ;;  %920 = vadd.xlane.f32.xlu0 %v919_v40  ;;  %1013 = vadd.xlane.f32.xlu1 %v1012_v41 }
 0x24c   :  { %728 = vadd.xlane.f32.xlu2 %v727_v5 }
 0x251   :  { %v2630_v58 = vpop.eup %2159 }
 0x252   :  { %v1015_v14 = vsel %vm59_vm0, %v2630_v58, 0.0 }
 0x253   :  { %1016 = vadd.xlane.f32.xlu0 %v1015_v14 }
 0x28e   :  { %v534_v51 = vpop.xlane.xlu2 %533 }
 0x28f   :  { %2161 = vrcp.f32 %v534_v51  ;;  %v438_v52 = vpop.xlane.xlu0 %437  ;;  %v549_v7 = vand.u32 2147483648, %v534_v51  ;;  %vm543_vm3 = vweird.f32 %v534_v51  ;;  %v547_v31 = vand.u32 2147483647, %v534_v51 }
 0x290   :  { %2163 = vrcp.f32 %v438_v52  ;;  %v453_v4 = vand.u32 2147483648, %v438_v52  ;;  %v451_v12 = vand.u32 2147483647, %v438_v52  ;;  %vm447_vm5 = vweird.f32 %v438_v52 }
 0x291   :  { %v550_v44 = vor.u32 1.1754944e-38, %v549_v7  ;;  %vm548_vm8 = vcmp.eq.f32.partialorder %v547_v31, 8.507059e+37 }
 0x292   :  { %v454_v22 = vor.u32 1.1754944e-38, %v453_v4  ;;  %vm452_vm9 = vcmp.eq.f32.partialorder %v451_v12, 8.507059e+37 }
 0x295   :  { %v2162_v50 = vpop.eup %2161 }
 0x296   :  { %v539_v54 = vmul.f32 %v2162_v50, %v534_v51  ;;  %v2634_v19 = vpop.xlane.xlu2 %341  ;;  %v2164_v55 = vpop.eup %2163  ;;  %vm544_vm2 = vweird.f32 %v2162_v50 }
 0x297   :  { %2165 = vrcp.f32 %v2634_v19  ;;  %v443_v62 = vmul.f32 %v2164_v55, %v438_v52  ;;  %v2637_v0 = vpop.xlane.xlu0 %821  ;;  %vm448_vm4 = vweird.f32 %v2164_v55  ;;  %vm545_vm6 = vmor %vm543_vm3, %vm544_vm2  ;;  %v357_v35 = vand.u32 2147483648, %v2634_v19 }
 0x298   :  { %v540_v63 = vsub.f32 1.0, %v539_v54  ;;  %2167 = vrcp.f32 %v2637_v0  ;;  %vm449_vm7 = vmor %vm447_vm5, %vm448_vm4  ;;  %v355_v6 = vand.u32 2147483647, %v2634_v19  ;;  %vm351_vm11 = vweird.f32 %v2634_v19  ;;  %v224_v54 = vpop.f32.mrf.mxu2 }
 0x299   :  { %v444_v1 = vsub.f32 1.0, %v443_v62  ;;  %v358_v42 = vor.u32 1.1754944e-38, %v357_v35  ;;  %972 = vmatpush.msrb.mxu3 %v224_v54  ;;  %vm831_vm15 = vweird.f32 %v2637_v0 }
 0x29a   :  { %v541_v32 = vmul.f32 %v2162_v50, %v540_v63  ;;  %vm356_vm13 = vcmp.eq.f32.partialorder %v355_v6, 8.507059e+37  ;;  %v835_v63 = vand.u32 2147483647, %v2637_v0 }
 0x29b   :  { %v445_v10 = vmul.f32 %v2164_v55, %v444_v1  ;;  %973 = vmatpush.msrb.mxu3 %v221_v27 }
 0x29c   :  { %v542_v13 = vadd.f32 %v2162_v50, %v541_v32 }
 0x29d   :  { %v2166_v43 = vpop.eup %2165  ;;  %v446_v15 = vadd.f32 %v2164_v55, %v445_v10 }
 0x29e   :  { %v546_v45 = vsel %vm545_vm6, %v2162_v50, %v542_v13  ;;  %v347_v17 = vmul.f32 %v2166_v43, %v2634_v19  ;;  %v2641_v18 = vpop.xlane.xlu2 %629  ;;  %v2643_v21 = vpop.eup %2167  ;;  %vm352_vm10 = vweird.f32 %v2166_v43 }
 0x29f   :  { %2169 = vrcp.f32 %v2641_v18  ;;  %v450_v23 = vsel %vm449_vm7, %v2164_v55, %v446_v15  ;;  %v551_v24 = vsel %vm548_vm8, %v550_v44, %v546_v45  ;;  %v2646_v26 = vpop.xlane.xlu0 %440  ;;  %v827_v30 = vmul.f32 %v2643_v21, %v2637_v0  ;;  %vm353_vm12 = vmor %vm351_vm11, %vm352_vm10 }
 0x2a0   :  { %v348_v59 = vsub.f32 1.0, %v347_v17  ;;  %v455_v28 = vsel %vm452_vm9, %v454_v22, %v450_v23  ;;  %2171 = vrcp.f32 %v2646_v26  ;;  %v566_v40 = vmul.f32 %v2546_v60, %v551_v24 }
 0x2a1   :  { %v470_v39 = vmul.f32 %v2551_v37, %v455_v28  ;;  %v828_v14 = vsub.f32 1.0, %v827_v30  ;;  %v645_v55 = vand.u32 2147483648, %v2641_v18  ;;  %v643_v62 = vand.u32 2147483647, %v2641_v18  ;;  %v244_v28 = vpop.f32.mrf.mxu3 }
 0x2a2   :  { %v349_v57 = vmul.f32 %v2166_v43, %v348_v59  ;;  %2063 = vmatmul.msk.f32.vlgmr.msra.gmra.mxu3 %vm59_vm0, %v566_v40  ;;  %vm639_vm1 = vweird.f32 %v2641_v18  ;;  %vm832_vm2 = vweird.f32 %v2643_v21  ;;  %v467_v32 = vand.u32 2147483648, %v2646_v26 }
 0x2a3   :  { %2061 = vmatmul.msk.f32.vlgmr.msrb.gmra.mxu2 %vm59_vm0, %v470_v39  ;;  %v829_v19 = vmul.f32 %v2643_v21, %v828_v14  ;;  %v646_v12 = vor.u32 1.1754944e-38, %v645_v55  ;;  %vm644_vm5 = vcmp.eq.f32.partialorder %v643_v62, 8.507059e+37  ;;  %vm2696_vm6 = vmor %vm831_vm15, %vm832_vm2  ;;  %v837_v22 = vand.u32 2147483648, %v2637_v0 }
 0x2a4   :  { %v350_v41 = vadd.f32 %v2166_v43, %v349_v57  ;;  %vm461_vm7 = vweird.f32 %v2646_v26  ;;  %v468_v24 = vor.u32 1.1754944e-38, %v467_v32  ;;  %vm836_vm10 = vcmp.eq.f32.partialorder %v835_v63, 8.507059e+37 }
 0x2a5   :  { %v2170_v5 = vpop.eup %2169  ;;  %v830_v31 = vadd.f32 %v2643_v21, %v829_v19  ;;  %v838_v39 = vor.u32 1.1754944e-38, %v837_v22  ;;  %v1221_v22 = vld [vmem:[%s3975_s5 + $0xf0] sm:$0xff] }
 0x2a6   :  { %v354_v8 = vsel %vm353_vm12, %v2166_v43, %v350_v41  ;;  %v635_v47 = vmul.f32 %v2170_v5, %v2641_v18  ;;  %v2659_v48 = vpop.xlane.xlu2 %917  ;;  %v2172_v37 = vpop.eup %2171  ;;  %vm640_vm14 = vweird.f32 %v2170_v5 }
 0x2a7   :  { %2173 = vrcp.f32 %v2659_v48  ;;  %v359_v60 = vsel %vm356_vm13, %v358_v42, %v354_v8  ;;  %v457_v51 = vmul.f32 %v2172_v37, %v2646_v26  ;;  %v2663_v50 = vpop.xlane.xlu0 %536  ;;  %vm2678_vm3 = vmor %vm639_vm1, %vm640_vm14  ;;  %vm462_vm4 = vweird.f32 %v2172_v37 }
 0x2a8   :  { %v636_v52 = vsub.f32 1.0, %v635_v47  ;;  %2175 = vrcp.f32 %v2663_v50  ;;  %v374_v29 = vmul.f32 %v2566_v49, %v359_v60  ;;  %v465_v49 = vand.u32 2147483647, %v2646_v26  ;;  %vm463_vm8 = vmor %vm461_vm7, %vm462_vm4  ;;  %v1233_v47 = vld [vmem:[%s3975_s5 + $0x150] sm:$0xff] }
 0x2a9   :  { %v458_v2 = vsub.f32 1.0, %v457_v51  ;;  %v834_v30 = vsel %vm2696_vm6, %v2643_v21, %v830_v31  ;;  %v931_v0 = vand.u32 2147483647, %v2659_v48  ;;  %v563_v57 = vand.u32 2147483648, %v2663_v50  ;;  %v247_v62 = vpop.f32.mrf.mxu3 }
 0x2aa   :  { %v637_v20 = vmul.f32 %v2170_v5, %v636_v52  ;;  %2059 = vmatmul.msk.f32.vlgmr.msra.gmra.mxu1 %vm59_vm0, %v374_v29  ;;  %vm466_vm9 = vcmp.eq.f32.partialorder %v465_v49, 8.507059e+37  ;;  %vm927_vm11 = vweird.f32 %v2659_v48  ;;  %v933_v21 = vand.u32 2147483648, %v2659_v48  ;;  %1068 = vmatpush.msra.mxu0 %v247_v62 }
 0x2ab   :  { %v459_v1 = vmul.f32 %v2172_v37, %v458_v2  ;;  %v839_v8 = vsel %vm836_vm10, %v838_v39, %v834_v30  ;;  %vm557_vm12 = vweird.f32 %v2663_v50  ;;  %vm2724_vm14 = vcmp.eq.f32.partialorder %v931_v0, 8.507059e+37  ;;  %v1204_v39 = vld [vmem:[%s3975_s5 + $0x68] sm:$0xff] }
 0x2ac   :  { %v638_v7 = vadd.f32 %v2170_v5, %v637_v20  ;;  %v934_v63 = vor.u32 1.1754944e-38, %v933_v21  ;;  %1069 = vmatpush.msra.mxu0 %v244_v28 }
 0x2ad   :  { %v2675_v4 = vpop.eup %2173  ;;  %v460_v44 = vadd.f32 %v2172_v37, %v459_v1 }
 0x2ae   :  { %v642_v13 = vsel %vm2678_vm3, %v2170_v5, %v638_v7  ;;  %v923_v43 = vmul.f32 %v2675_v4, %v2659_v48  ;;  %v2688_v15 = vpop.xlane.xlu1 %344  ;;  %v2690_v45 = vpop.xlane.xlu2 %725  ;;  %vm928_vm15 = vweird.f32 %v2675_v4 }
 0x2af   :  { %v2176_v17 = vpop.eup %2175  ;;  %v647_v23 = vsel %vm644_vm5, %v646_v12, %v642_v13  ;;  %2177 = vrcp.f32 %v2688_v15  ;;  %v464_v33 = vsel %vm463_vm8, %v2172_v37, %v460_v44  ;;  %v371_v2 = vand.u32 2147483648, %v2688_v15  ;;  %vm2747_vm3 = vmor %vm927_vm11, %vm928_vm15 }
 0x2b0   :  { %v553_v59 = vmul.f32 %v2176_v17, %v2663_v50  ;;  %v924_v27 = vsub.f32 1.0, %v923_v43  ;;  %2179 = vrcp.f32 %v2690_v45  ;;  %v469_v35 = vsel %vm466_vm9, %v468_v24, %v464_v33 }
 0x2b1   :  { %v662_v6 = vmul.f32 %v2580_v61, %v647_v23  ;;  %v471_v41 = vmul.f32 %v2575_v56, %v469_v35  ;;  %vm558_vm13 = vweird.f32 %v2176_v17  ;;  %v561_v61 = vand.u32 2147483647, %v2663_v50  ;;  %v1205_v23 = vld [vmem:[%s3975_s5 + $0x70] sm:$0xff] }
 0x2b2   :  { %v554_v26 = vsub.f32 1.0, %v553_v59  ;;  %v925_v40 = vmul.f32 %v2675_v4, %v924_v27  ;;  %v564_v56 = vor.u32 1.1754944e-38, %v563_v57  ;;  %v739_v20 = vand.u32 2147483647, %v2690_v45  ;;  %vm559_vm1 = vmor %vm557_vm12, %vm558_vm13 }
 0x2b3   :  { %2065 = vmatmul.msk.f32.vlgmr.msrb.gmra.mxu0 %vm59_vm0, %v662_v6  ;;  %2062 = vmatmul.msk.f32.gmra.mxu2 %vm59_vm0, %v471_v41  ;;  %vm562_vm2 = vcmp.eq.f32.partialorder %v561_v61, 8.507059e+37  ;;  %v741_v31 = vand.u32 2147483648, %v2690_v45  ;;  %v854_v50 = vmul.f32 %v2569_v53, %v839_v8  ;;  %vm365_vm5 = vweird.f32 %v2688_v15  ;;  %v1222_v53 = vld [vmem:[%s3975_s5 + $0xf8] sm:$0xff]  ;;  %v1237_v8 = vld [vmem:[%s3975_s5 + $0x170] sm:$0xff] }
 0x2b4   :  { %v555_v5 = vmul.f32 %v2176_v17, %v554_v26  ;;  %v926_v54 = vadd.f32 %v2675_v4, %v925_v40  ;;  %v2761_v48 = vor.u32 1.1754944e-38, %v371_v2  ;;  %vm735_vm6 = vweird.f32 %v2690_v45  ;;  %1342 = vmatpush.msrb.mxu2 %v1222_v53  ;;  %v1238_v40 = vld [vmem:[%s3975_s5 + $0x178] sm:$0xff] }
 0x2b5   :  { %v2717_v14 = vpop.eup %2177  ;;  %vm2764_vm7 = vcmp.eq.f32.partialorder %v739_v20, 8.507059e+37  ;;  %v369_v18 = vand.u32 2147483647, %v2688_v15  ;;  %v742_v28 = vor.u32 1.1754944e-38, %v741_v31  ;;  %1365 = vmatpush.msra.mxu3 %v1238_v40 }
 0x2b6   :  { %v2722_v42 = vpop.eup %2179  ;;  %v361_v37 = vmul.f32 %v2717_v14, %v2688_v15  ;;  %v2730_v60 = vpop.xlane.xlu1 %824  ;;  %v556_v52 = vadd.f32 %v2176_v17, %v555_v5  ;;  %v930_v12 = vsel %vm2747_vm3, %v2675_v4, %v926_v54  ;;  %vm366_vm4 = vweird.f32 %v2717_v14  ;;  %v1220_v15 = vld [vmem:[%s3975_s5 + $0xe8] sm:$0xff]  ;;  %1343 = vmatpush.msrb.mxu2 %v1221_v22  ;;  %v1254_v54 = vld [vmem:[%s3975_s5 + $0x1f8] sm:$0xff] }
 0x2b7   :  { %v2732_v51 = vpop.xlane.xlu0 %632  ;;  %v731_v19 = vmul.f32 %v2722_v42, %v2690_v45  ;;  %2181 = vrcp.f32 %v2730_v60  ;;  %vm736_vm8 = vweird.f32 %v2722_v42  ;;  %v851_v44 = vand.u32 2147483648, %v2730_v60  ;;  %vm2803_vm9 = vmor %vm365_vm5, %vm366_vm4  ;;  %1366 = vmatpush.msra.mxu3 %v1237_v8  ;;  %1388 = vmatpush.msrb.mxu0 %v1254_v54  ;;  %v1199_v8 = vld [vmem:[%s3975_s5 + $0x40] sm:$0xff] }
 0x2b8   :  { %v362_v55 = vsub.f32 1.0, %v361_v37  ;;  %2183 = vrcp.f32 %v2732_v51  ;;  %v560_v1 = vsel %vm559_vm1, %v2176_v17, %v556_v52  ;;  %v935_v59 = vsel %vm2724_vm14, %v934_v63, %v930_v12  ;;  %vm2827_vm11 = vmor %vm735_vm6, %vm736_vm8  ;;  %v1219_v37 = vld [vmem:[%s3975_s5 + $0xe0] sm:$0xff]  ;;  %1344 = vmatpush.msrb.mxu2 %v1220_v15 }
 0x2b9   :  { %v732_v29 = vsub.f32 1.0, %v731_v19  ;;  %v565_v10 = vsel %vm562_vm2, %v564_v56, %v560_v1  ;;  %vm845_vm10 = vweird.f32 %v2730_v60  ;;  %v659_v35 = vand.u32 2147483648, %v2732_v51  ;;  %v1203_v52 = vld [vmem:[%s3975_s5 + $0x60] sm:$0xff] }
 0x2ba   :  { %v363_v7 = vmul.f32 %v2717_v14, %v362_v55  ;;  %v567_v13 = vmul.f32 %v2591_v11, %v565_v10  ;;  %v1206_v11 = vld [vmem:[%s3975_s5 + $0x78] sm:$0xff]  ;;  %vm653_vm12 = vweird.f32 %v2732_v51  ;;  %v657_v21 = vand.u32 2147483647, %v2732_v51  ;;  %v1253_v55 = vld [vmem:[%s3975_s5 + $0x1f0] sm:$0xff]  ;;  %1345 = vmatpush.msrb.mxu2 %v1219_v37 }
 0x2bb   :  { %v733_v49 = vmul.f32 %v2722_v42, %v732_v29  ;;  %2069 = vmatmul.msk.f32.vlgmr.msra.gmra.mxu2 %vm59_vm0, %v854_v50  ;;  %1319 = vmatpush.msra.mxu1 %v1206_v11  ;;  %v2837_v61 = vor.u32 1.1754944e-38, %v851_v44  ;;  %vm2842_vm13 = vcmp.eq.f32.partialorder %v369_v18, 8.507059e+37  ;;  %v660_v20 = vor.u32 1.1754944e-38, %v659_v35  ;;  %v1202_v29 = vld [vmem:[%s3975_s5 + $0x58] sm:$0xff]  ;;  %v1235_v44 = vld [vmem:[%s3975_s5 + $0x160] sm:$0xff] }
 0x2bc   :  { %2064 = vmatmul.msk.f32.gmra.mxu3 %vm59_vm0, %v567_v13  ;;  %v364_v17 = vadd.f32 %v2717_v14, %v363_v7  ;;  %v950_v62 = vmul.f32 %v2587_v3, %v935_v59  ;;  %v849_v63 = vand.u32 2147483647, %v2730_v60  ;;  %vm2877_vm1 = vcmp.eq.f32.partialorder %v657_v21, 8.507059e+37  ;;  %v1236_v7 = vld [vmem:[%s3975_s5 + $0x168] sm:$0xff]  ;;  %v1217_v13 = vld [vmem:[%s3975_s5 + $0xd0] sm:$0xff]  ;;  %1389 = vmatpush.msrb.mxu0 %v1253_v55 }
 0x2bd   :  { %v2774_v4 = vpop.eup %2181  ;;  %v734_v27 = vadd.f32 %v2722_v42, %v733_v49  ;;  %1320 = vmatpush.msra.mxu1 %v1205_v23  ;;  %v1216_v23 = vld [vmem:[%s3975_s5 + $0xc8] sm:$0xff]  ;;  %1367 = vmatpush.msra.mxu3 %v1236_v7 }
 0x2be   :  { %v2788_v24 = vpop.eup %2183  ;;  %v841_v30 = vmul.f32 %v2774_v4, %v2730_v60  ;;  %v2797_v33 = vpop.xlane.xlu1 %1013  ;;  %v368_v56 = vsel %vm2803_vm9, %v2717_v14, %v364_v17  ;;  %vm846_vm14 = vweird.f32 %v2774_v4  ;;  %v1252_v17 = vld [vmem:[%s3975_s5 + $0x1e8] sm:$0xff]  ;;  %vm850_vm6 = vcmp.eq.f32.partialorder %v849_v63, 8.507059e+37  ;;  %v1213_v63 = vld [vmem:[%s3975_s5 + $0xb0] sm:$0xff] }
 0x2bf   :  { %v2795_v0 = vpop.xlane.xlu0 %920  ;;  %v649_v57 = vmul.f32 %v2788_v24, %v2732_v51  ;;  %v2812_v6 = vpop.xlane.xlu2 %728  ;;  %v738_v14 = vsel %vm2827_vm11, %v2722_v42, %v734_v27  ;;  %1321 = vmatpush.msra.mxu1 %v1204_v39  ;;  %v1218_v42 = vld [vmem:[%s3975_s5 + $0xd8] sm:$0xff]  ;;  %v373_v1 = vsel %vm2842_vm13, %v2761_v48, %v368_v56  ;;  %vm654_vm15 = vweird.f32 %v2788_v24  ;;  %vm2897_vm3 = vmor %vm845_vm10, %vm846_vm14  ;;  %v1200_v59 = vld [vmem:[%s3975_s5 + $0x48] sm:$0xff]  ;;  %1368 = vmatpush.msra.mxu3 %v1235_v44 }
 0x2c0   :  { %2185 = vrcp.f32 %v2795_v0  ;;  %v842_v5 = vsub.f32 1.0, %v841_v30  ;;  %v743_v10 = vsel %vm2764_vm7, %v742_v28, %v738_v14  ;;  %vm941_vm2 = vweird.f32 %v2795_v0  ;;  %1346 = vmatpush.msrb.mxu2 %v1218_v42  ;;  %vm2933_vm5 = vmor %vm653_vm12, %vm654_vm15  ;;  %1390 = vmatpush.msrb.mxu0 %v1252_v17  ;;  %v1214_v56 = vld [vmem:[%s3975_s5 + $0xb8] sm:$0xff]  ;;  %v1232_v3 = vld [vmem:[%s3975_s5 + $0x148] sm:$0xff] }
 0x2c1   :  { %2187 = vrcp.f32 %v2797_v33  ;;  %v650_v45 = vsub.f32 1.0, %v649_v57  ;;  %1322 = vmatpush.msra.mxu1 %v1203_v52  ;;  %v375_v50 = vmul.f32 %v2600_v46, %v373_v1  ;;  %v1201_v46 = vld [vmem:[%s3975_s5 + $0x50] sm:$0xff]  ;;  %v947_v60 = vand.u32 2147483648, %v2795_v0  ;;  %v1234_v57 = vld [vmem:[%s3975_s5 + $0x158] sm:$0xff] }
 0x2c2   :  { %v843_v19 = vmul.f32 %v2774_v4, %v842_v5  ;;  %2189 = vrcp.f32 %v2812_v6  ;;  %vm1023_vm4 = vweird.f32 %v2797_v33  ;;  %v1027_v22 = vand.u32 2147483647, %v2797_v33  ;;  %1347 = vmatpush.msrb.mxu2 %v1217_v13  ;;  %1369 = vmatpush.msra.mxu3 %v1234_v57  ;;  %v1250_v14 = vld [vmem:[%s3975_s5 + $0x1d8] sm:$0xff] }
 0x2c3   :  { %v651_v2 = vmul.f32 %v2788_v24, %v650_v45  ;;  %1323 = vmatpush.msra.mxu1 %v1202_v29  ;;  %v1029_v30 = vand.u32 2147483648, %v2797_v33  ;;  %v948_v5 = vor.u32 1.1754944e-38, %v947_v60  ;;  %vm749_vm9 = vweird.f32 %v2812_v6 }
 0x2c4   :  { %v844_v32 = vadd.f32 %v2774_v4, %v843_v19  ;;  %2071 = vmatmul.msk.f32.vlgmr.msrb.gmra.mxu3 %vm59_vm0, %v950_v62  ;;  %2060 = vmatmul.msk.f32.gmra.mxu1 %vm59_vm0, %v375_v50  ;;  %v755_v37 = vand.u32 2147483648, %v2812_v6  ;;  %v758_v52 = vmul.f32 %v2597_v16, %v743_v10  ;;  %v1198_v62 = vld [vmem:[%s3975_s5 + $0x38] sm:$0xff]  ;;  %vm1028_vm14 = vcmp.eq.f32.partialorder %v1027_v22, 8.507059e+37  ;;  %v1197_v50 = vld [vmem:[%s3975_s5 + $0x30] sm:$0xff]  ;;  %v1223_v16 = vld [vmem:[%s3975_s5 + $0x100] sm:$0xff] }
 0x2c5   :  { %v652_v12 = vadd.f32 %v2788_v24, %v651_v2  ;;  %1324 = vmatpush.msra.mxu1 %v1201_v46  ;;  %1348 = vmatpush.msrb.mxu2 %v1216_v23  ;;  %v1030_v42 = vor.u32 1.1754944e-38, %v1029_v30  ;;  %v1212_v46 = vld [vmem:[%s3975_s5 + $0xa8] sm:$0xff]  ;;  %v1230_v23 = vld [vmem:[%s3975_s5 + $0x138] sm:$0xff] }
 0x2c6   :  { %v2885_v31 = vpop.eup %2185  ;;  %v848_v11 = vsel %vm2897_vm3, %v2774_v4, %v844_v32  ;;  %1370 = vmatpush.msra.mxu3 %v1233_v47  ;;  %v1249_v32 = vld [vmem:[%s3975_s5 + $0x1d0] sm:$0xff]  ;;  %v756_v49 = vor.u32 1.1754944e-38, %v755_v37  ;;  %v1195_v4 = vld [vmem:[%s3975_s5 + $0x20] sm:$0xff] }
 0x2c7   :  { %v2907_v48 = vpop.eup %2187  ;;  %v937_v43 = vmul.f32 %v2885_v31, %v2795_v0  ;;  %v2913_v53 = vpop.xlane.xlu0 %1016  ;;  %v656_v51 = vsel %vm2933_vm5, %v2788_v24, %v652_v12  ;;  %v853_v26 = vsel %vm850_vm6, %v2837_v61, %v848_v11  ;;  %v1215_v24 = vld [vmem:[%s3975_s5 + $0xc0] sm:$0xff]  ;;  %vm942_vm7 = vweird.f32 %v2885_v31  ;;  %1325 = vmatpush.msra.mxu1 %v1200_v59  ;;  %v1285_v47 = vld [vmem:[%s3975_s5 + $0x2f0] sm:$0xff] }
 0x2c8   :  { %v1019_v18 = vmul.f32 %v2907_v48, %v2797_v33  ;;  %2191 = vrcp.f32 %v2913_v53  ;;  %v2943_v27 = vpop.eup %2189  ;;  %v661_v39 = vsel %vm2877_vm1, %v660_v20, %v656_v51  ;;  %v855_v40 = vmul.f32 %v2607_v25, %v853_v26  ;;  %v1251_v25 = vld [vmem:[%s3975_s5 + $0x1e0] sm:$0xff]  ;;  %1349 = vmatpush.msrb.mxu2 %v1215_v24  ;;  %vm2998_vm11 = vmor %vm941_vm2, %vm942_vm7  ;;  %1371 = vmatpush.msra.mxu3 %v1232_v3  ;;  %v1209_v51 = vld [vmem:[%s3975_s5 + $0x90] sm:$0xff] }
 0x2c9   :  { %v938_v28 = vsub.f32 1.0, %v937_v43  ;;  %v745_v15 = vmul.f32 %v2943_v27, %v2812_v6  ;;  %v663_v21 = vmul.f32 %v2611_v34, %v661_v39  ;;  %vm1024_vm8 = vweird.f32 %v2907_v48  ;;  %1326 = vmatpush.msra.mxu1 %v1199_v8  ;;  %1391 = vmatpush.msrb.mxu0 %v1251_v25  ;;  %v1229_v26 = vld [vmem:[%s3975_s5 + $0x130] sm:$0xff]  ;;  %v1228_v24 = vld [vmem:[%s3975_s5 + $0x128] sm:$0xff]  ;;  %v1286_v8 = vld [vmem:[%s3975_s5 + $0x2f8] sm:$0xff] }
 0x2ca   :  { %v1020_v35 = vsub.f32 1.0, %v1019_v18  ;;  %2070 = vmatmul.msk.f32.gmra.mxu2 %vm59_vm0, %v855_v40  ;;  %v945_v34 = vand.u32 2147483647, %v2795_v0  ;;  %vm750_vm10 = vweird.f32 %v2943_v27  ;;  %v753_v20 = vand.u32 2147483647, %v2812_v6  ;;  %vm3012_vm12 = vmor %vm1023_vm4, %vm1024_vm8  ;;  %v1248_v18 = vld [vmem:[%s3975_s5 + $0x1c8] sm:$0xff] }
 0x2cb   :  { %v939_v41 = vmul.f32 %v2885_v31, %v938_v28  ;;  %v746_v45 = vsub.f32 1.0, %v745_v15  ;;  %2066 = vmatmul.msk.f32.gmra.mxu0 %vm59_vm0, %v663_v21  ;;  %1350 = vmatpush.msrb.mxu2 %v1214_v56  ;;  %vm751_vm15 = vmor %vm749_vm9, %vm750_vm10  ;;  %v1043_v43 = vand.u32 2147483648, %v2913_v53  ;;  %v1041_v17 = vand.u32 2147483647, %v2913_v53  ;;  %v1247_v28 = vld [vmem:[%s3975_s5 + $0x1c0] sm:$0xff]  ;;  %v1193_v15 = vld [vmem:[%s3975_s5 + $0x10] sm:$0xff] }
 0x2cc   :  { %v1021_v61 = vmul.f32 %v2907_v48, %v1020_v35  ;;  %vm946_vm13 = vcmp.eq.f32.partialorder %v945_v34, 8.507059e+37  ;;  %2067 = vmatmul.msk.f32.vlgmr.msrb.gmra.mxu1 %vm59_vm0, %v758_v52  ;;  %1392 = vmatpush.msrb.mxu0 %v1250_v14  ;;  %vm754_vm1 = vcmp.eq.f32.partialorder %v753_v20, 8.507059e+37  ;;  %vm1037_vm3 = vweird.f32 %v2913_v53  ;;  %v1246_v35 = vld [vmem:[%s3975_s5 + $0x1b8] sm:$0xff]  ;;  %v1208_v40 = vld [vmem:[%s3975_s5 + $0x88] sm:$0xff]  ;;  %v1227_v21 = vld [vmem:[%s3975_s5 + $0x120] sm:$0xff] }
 0x2cd   :  { %v940_v54 = vadd.f32 %v2885_v31, %v939_v41  ;;  %v747_v2 = vmul.f32 %v2943_v27, %v746_v45  ;;  %1327 = vmatpush.msra.mxu1 %v1198_v62  ;;  %1351 = vmatpush.msrb.mxu2 %v1213_v63  ;;  %vm1042_vm5 = vcmp.eq.f32.partialorder %v1041_v17, 8.507059e+37  ;;  %v1192_v41 = vld [vmem:[%s3975_s5 + $0x8] sm:$0xff]  ;;  %v1226_v45 = vld [vmem:[%s3975_s5 + $0x118] sm:$0xff]  ;;  %v1243_v56 = vld [vmem:[%s3975_s5 + $0x1a0] sm:$0xff] }
 0x2ce   :  { %v2988_v19 = vpop.eup %2191  ;;  %v1022_v55 = vadd.f32 %v2907_v48, %v1021_v61  ;;  %1393 = vmatpush.msrb.mxu0 %v1249_v32  ;;  %v1244_v25 = vld [vmem:[%s3975_s5 + $0x1a8] sm:$0xff]  ;;  %v1191_v61 = vld [vmem:[%s3975_s5] sm:$0xff]  ;;  %v1270_v34 = vld [vmem:[%s3975_s5 + $0x278] sm:$0xff] }
 0x2cf   :  { %v1033_v29 = vmul.f32 %v2988_v19, %v2913_v53  ;;  %v944_v1 = vsel %vm2998_vm11, %v2885_v31, %v940_v54  ;;  %v748_v31 = vadd.f32 %v2943_v27, %v747_v2  ;;  %vm1038_vm2 = vweird.f32 %v2988_v19  ;;  %1328 = vmatpush.msra.mxu1 %v1197_v50  ;;  %1352 = vmatpush.msrb.mxu2 %v1212_v46  ;;  %v1194_v53 = vld [vmem:[%s3975_s5 + $0x18] sm:$0xff]  ;;  %v1225_v37 = vld [vmem:[%s3975_s5 + $0x110] sm:$0xff]  ;;  %v1284_v14 = vld [vmem:[%s3975_s5 + $0x2e8] sm:$0xff] }
 0x2d0   :  { %v1026_v7 = vsel %vm3012_vm12, %v2907_v48, %v1022_v55  ;;  %v949_v10 = vsel %vm946_vm13, %v948_v5, %v944_v1  ;;  %v1231_v48 = vld [vmem:[%s3975_s5 + $0x140] sm:$0xff]  ;;  %vm1039_vm4 = vmor %vm1037_vm3, %vm1038_vm2  ;;  %1394 = vmatpush.msrb.mxu0 %v1248_v18  ;;  %v1269_v52 = vld [vmem:[%s3975_s5 + $0x270] sm:$0xff] }
 0x2d1   :  { %v1031_v12 = vsel %vm1028_vm14, %v1030_v42, %v1026_v7  ;;  %v1034_v13 = vsub.f32 1.0, %v1033_v29  ;;  %v951_v33 = vmul.f32 %v2617_v36, %v949_v10  ;;  %v752_v60 = vsel %vm751_vm15, %v2943_v27, %v748_v31  ;;  %v1196_v36 = vld [vmem:[%s3975_s5 + $0x28] sm:$0xff]  ;;  %1372 = vmatpush.msra.mxu3 %v1231_v48  ;;  %v1207_v5 = vld [vmem:[%s3975_s5 + $0x80] sm:$0xff]  ;;  %v1242_v54 = vld [vmem:[%s3975_s5 + $0x198] sm:$0xff] }
 0x2d2   :  { %v1046_v6 = vmul.f32 %v2620_v9, %v1031_v12  ;;  %v757_v44 = vsel %vm754_vm1, %v756_v49, %v752_v60  ;;  %v1211_v9 = vld [vmem:[%s3975_s5 + $0xa0] sm:$0xff]  ;;  %1329 = vmatpush.msra.mxu1 %v1196_v36  ;;  %v1044_v27 = vor.u32 1.1754944e-38, %v1043_v43  ;;  %1395 = vmatpush.msrb.mxu0 %v1247_v28  ;;  %v1268_v55 = vld [vmem:[%s3975_s5 + $0x268] sm:$0xff]  ;;  %v1241_v2 = vld [vmem:[%s3975_s5 + $0x190] sm:$0xff] }
 0x2d3   :  { %v1035_v11 = vmul.f32 %v2988_v19, %v1034_v13  ;;  %2072 = vmatmul.msk.f32.gmra.mxu3 %vm59_vm0, %v951_v33  ;;  %v759_v22 = vmul.f32 %v2622_v38, %v757_v44  ;;  %v1210_v38 = vld [vmem:[%s3975_s5 + $0x98] sm:$0xff]  ;;  %1353 = vmatpush.msrb.mxu2 %v1211_v9  ;;  %v1283_v20 = vld [vmem:[%s3975_s5 + $0x2e0] sm:$0xff]  ;;  %v1240_v63 = vld [vmem:[%s3975_s5 + $0x188] sm:$0xff] }
 0x2d4   :  { %2073 = vmatmul.msk.f32.vlgmr.msra.gmra.mxu0 %vm59_vm0, %v1046_v6  ;;  %1330 = vmatpush.msra.mxu1 %v1195_v4  ;;  %v1267_v62 = vld [vmem:[%s3975_s5 + $0x260] sm:$0xff]  ;;  %v1282_v0 = vld [vmem:[%s3975_s5 + $0x2d8] sm:$0xff]  ;;  %v1281_v3 = vld [vmem:[%s3975_s5 + $0x2d0] sm:$0xff] }
 0x2d5   :  { %v1036_v59 = vadd.f32 %v2988_v19, %v1035_v11  ;;  %1373 = vmatpush.msra.mxu3 %v1230_v23  ;;  %2068 = vmatmul.msk.f32.gmra.mxu1 %vm59_vm0, %v759_v22  ;;  %v1302_v42 = vld [vmem:[%s3975_s5 + $0x378] sm:$0xff]  ;;  %v1239_v1 = vld [vmem:[%s3975_s5 + $0x180] sm:$0xff]  ;;  %v1301_v32 = vld [vmem:[%s3975_s5 + $0x370] sm:$0xff] }
 0x2d6   :  { %1354 = vmatpush.msrb.mxu2 %v1210_v38  ;;  %1331 = vmatpush.msra.mxu1 %v1194_v53  ;;  %v1266_v29 = vld [vmem:[%s3975_s5 + $0x258] sm:$0xff]  ;;  %v1265_v31 = vld [vmem:[%s3975_s5 + $0x250] sm:$0xff]  ;;  %v1280_v10 = vld [vmem:[%s3975_s5 + $0x2c8] sm:$0xff] }
 0x2d7   :  { %v1040_v30 = vsel %vm1039_vm4, %v2988_v19, %v1036_v59  ;;  %1374 = vmatpush.msra.mxu3 %v1229_v26  ;;  %1396 = vmatpush.msrb.mxu0 %v1246_v35  ;;  %v1224_v19 = vld [vmem:[%s3975_s5 + $0x108] sm:$0xff]  ;;  %v1318_v7 = vld [vmem:[%s3975_s5 + $0x3f8] sm:$0xff]  ;;  %v1317_v12 = vld [vmem:[%s3975_s5 + $0x3f0] sm:$0xff] }
 0x2d8   :  { %v1045_v57 = vsel %vm1042_vm5, %v1044_v27, %v1040_v30  ;;  %1355 = vmatpush.msrb.mxu2 %v1209_v51  ;;  %1332 = vmatpush.msra.mxu1 %v1193_v15  ;;  %v1300_v50 = vld [vmem:[%s3975_s5 + $0x368] sm:$0xff]  ;;  %v1279_v13 = vld [vmem:[%s3975_s5 + $0x2c0] sm:$0xff]  ;;  %v1278_v43 = vld [vmem:[%s3975_s5 + $0x2b8] sm:$0xff] }
 0x2d9   :  { %v1047_v39 = vmul.f32 %v2630_v58, %v1045_v57  ;;  %v1245_v58 = vld [vmem:[%s3975_s5 + $0x1b0] sm:$0xff]  ;;  %1375 = vmatpush.msra.mxu3 %v1228_v24  ;;  %v1264_v49 = vld [vmem:[%s3975_s5 + $0x248] sm:$0xff]  ;;  %v1299_v33 = vld [vmem:[%s3975_s5 + $0x360] sm:$0xff] }
 0x2da   :  { %1356 = vmatpush.msrb.mxu2 %v1208_v40  ;;  %1333 = vmatpush.msra.mxu1 %v1192_v41  ;;  %v1316_v46 = vld [vmem:[%s3975_s5 + $0x3e8] sm:$0xff]  ;;  %v1263_v48 = vld [vmem:[%s3975_s5 + $0x240] sm:$0xff]  ;;  %v1298_v60 = vld [vmem:[%s3975_s5 + $0x358] sm:$0xff] }
 0x2db   :  { %1397 = vmatpush.msrb.mxu0 %v1245_v58  ;;  %1376 = vmatpush.msra.mxu3 %v1227_v21  ;;  %v1315_v6 = vld [vmem:[%s3975_s5 + $0x3e0] sm:$0xff]  ;;  %v1262_v36 = vld [vmem:[%s3975_s5 + $0x238] sm:$0xff]  ;;  %v1277_v11 = vld [vmem:[%s3975_s5 + $0x2b0] sm:$0xff] }
 0x2dc   :  { %2074 = vmatmul.msk.f32.gmra.mxu0 %vm59_vm0, %v1047_v39  ;;  %1357 = vmatpush.msrb.mxu2 %v1207_v5  ;;  %v1297_v44 = vld [vmem:[%s3975_s5 + $0x350] sm:$0xff]  ;;  %v1314_v17 = vld [vmem:[%s3975_s5 + $0x3d8] sm:$0xff]  ;;  %v1276_v18 = vld [vmem:[%s3975_s5 + $0x2a8] sm:$0xff] }
 0x2dd   :  { %1398 = vmatpush.msrb.mxu0 %v1244_v25  ;;  %1334 = vmatpush.msra.mxu1 %v1191_v61  ;;  %v1261_v9 = vld [vmem:[%s3975_s5 + $0x230] sm:$0xff]  ;;  %v1296_v22 = vld [vmem:[%s3975_s5 + $0x348] sm:$0xff]  ;;  %v1275_v59 = vld [vmem:[%s3975_s5 + $0x2a0] sm:$0xff] }
 0x2de   :  { %1434 = vmatpush.msra.mxu2 %v1286_v8  ;;  %1377 = vmatpush.msra.mxu3 %v1226_v45  ;;  %v1313_v4 = vld [vmem:[%s3975_s5 + $0x3d0] sm:$0xff]  ;;  %v1260_v23 = vld [vmem:[%s3975_s5 + $0x228] sm:$0xff]  ;;  %v1295_v38 = vld [vmem:[%s3975_s5 + $0x340] sm:$0xff] }
 0x2df   :  { %1411 = vmatpush.msrb.mxu1 %v1270_v34  ;;  %1399 = vmatpush.msrb.mxu0 %v1243_v56  ;;  %v1312_v27 = vld [vmem:[%s3975_s5 + $0x3c8] sm:$0xff]  ;;  %v1259_v28 = vld [vmem:[%s3975_s5 + $0x220] sm:$0xff]  ;;  %v1274_v53 = vld [vmem:[%s3975_s5 + $0x298] sm:$0xff] }
 0x2e0   :  { %1435 = vmatpush.msra.mxu2 %v1285_v47  ;;  %1378 = vmatpush.msra.mxu3 %v1225_v37  ;;  %v1294_v30 = vld [vmem:[%s3975_s5 + $0x338] sm:$0xff]  ;;  %v1311_v51 = vld [vmem:[%s3975_s5 + $0x3c0] sm:$0xff]  ;;  %v1273_v57 = vld [vmem:[%s3975_s5 + $0x290] sm:$0xff] }
 0x2e1   :  { %1412 = vmatpush.msrb.mxu1 %v1269_v52  ;;  %1400 = vmatpush.msrb.mxu0 %v1242_v54  ;;  %v1258_v26 = vld [vmem:[%s3975_s5 + $0x218] sm:$0xff]  ;;  %v1293_v35 = vld [vmem:[%s3975_s5 + $0x330] sm:$0xff]  ;;  %v1272_v40 = vld [vmem:[%s3975_s5 + $0x288] sm:$0xff] }
 0x2e2   :  { %1436 = vmatpush.msra.mxu2 %v1284_v14  ;;  %1379 = vmatpush.msra.mxu3 %v1224_v19  ;;  %v1310_v15 = vld [vmem:[%s3975_s5 + $0x3b8] sm:$0xff]  ;;  %v1257_v39 = vld [vmem:[%s3975_s5 + $0x210] sm:$0xff]  ;;  %v3299_v24 = vld [vmem:[%s3974_s4] sm:$0xff] }
 0x2e3   :  { %1413 = vmatpush.msrb.mxu1 %v1268_v55  ;;  %1401 = vmatpush.msrb.mxu0 %v1241_v2  ;;  %v1292_v41 = vld [vmem:[%s3975_s5 + $0x328] sm:$0xff]  ;;  %v1309_v58 = vld [vmem:[%s3975_s5 + $0x3b0] sm:$0xff]  ;;  %v1271_v21 = vld [vmem:[%s3975_s5 + $0x280] sm:$0xff]  ;;  %v1080_v61 = vperm.slane %v3299_v24, 1  ;;  %v1081_v45 = vperm.slane %v3299_v24, 2  ;;  %v1079_v54 = vperm.slane %v3299_v24, 0 }
 0x2e4   :  { %1437 = vmatpush.msra.mxu2 %v1283_v20  ;;  %1380 = vmatpush.msra.mxu3 %v1223_v16  ;;  %v1256_v5 = vld [vmem:[%s3975_s5 + $0x208] sm:$0xff]  ;;  %v1291_v8 = vld [vmem:[%s3975_s5 + $0x320] sm:$0xff]  ;;  %v1290_v56 = vld [vmem:[%s3975_s5 + $0x318] sm:$0xff] }
 0x2e5   :  { %1414 = vmatpush.msrb.mxu1 %v1267_v62  ;;  %1402 = vmatpush.msrb.mxu0 %v1240_v63  ;;  %v1308_v25 = vld [vmem:[%s3975_s5 + $0x3a8] sm:$0xff]  ;;  %v1255_v34 = vld [vmem:[%s3975_s5 + $0x200] sm:$0xff]  ;;  %v1289_v14 = vld [vmem:[%s3975_s5 + $0x310] sm:$0xff] }
 0x2e6   :  { %1438 = vmatpush.msra.mxu2 %v1282_v0  ;;  %1457 = vmatpush.msrb.mxu3 %v1302_v42  ;;  %v1307_v47 = vld [vmem:[%s3975_s5 + $0x3a0] sm:$0xff]  ;;  %v1306_v19 = vld [vmem:[%s3975_s5 + $0x398] sm:$0xff]  ;;  %v1288_v16 = vld [vmem:[%s3975_s5 + $0x308] sm:$0xff] }
 0x2e7   :  { %1415 = vmatpush.msrb.mxu1 %v1266_v29  ;;  %1403 = vmatpush.msrb.mxu0 %v1239_v1  ;;  %v1305_v62 = vld [vmem:[%s3975_s5 + $0x390] sm:$0xff]  ;;  %v1287_v29 = vld [vmem:[%s3975_s5 + $0x300] sm:$0xff]  ;;  %v1304_v1 = vld [vmem:[%s3975_s5 + $0x388] sm:$0xff] }
 0x2e8   :  { %1439 = vmatpush.msra.mxu2 %v1281_v3  ;;  %1458 = vmatpush.msrb.mxu3 %v1301_v32  ;;  %v1082_v32 = vperm.slane %v3299_v24, 3 }
 0x2e9   :  { %1480 = vmatpush.msra.mxu0 %v1318_v7  ;;  %1416 = vmatpush.msrb.mxu1 %v1265_v31  ;;  %v1303_v7 = vld [vmem:[%s3975_s5 + $0x380] sm:$0xff] }
 0x2ea   :  { %1440 = vmatpush.msra.mxu2 %v1280_v10  ;;  %1459 = vmatpush.msrb.mxu3 %v1300_v50 }
 0x2eb   :  { %1481 = vmatpush.msra.mxu0 %v1317_v12  ;;  %1417 = vmatpush.msrb.mxu1 %v1264_v49 }
 0x2ec   :  { %1441 = vmatpush.msra.mxu2 %v1279_v13  ;;  %1460 = vmatpush.msrb.mxu3 %v1299_v33 }
 0x2ed   :  { %1482 = vmatpush.msra.mxu0 %v1316_v46  ;;  %1418 = vmatpush.msrb.mxu1 %v1263_v48  ;;  %v1534_v46 = vld [vmem:[%s3976_s6 + $0xf8] sm:$0xff] }
 0x2ee   :  { %1442 = vmatpush.msra.mxu2 %v1278_v43  ;;  %1461 = vmatpush.msrb.mxu3 %v1298_v60  ;;  %v1550_v60 = vld [vmem:[%s3976_s6 + $0x178] sm:$0xff] }
 0x2ef   :  { %1483 = vmatpush.msra.mxu0 %v1315_v6  ;;  %1419 = vmatpush.msrb.mxu1 %v1262_v36 }
 0x2f0   :  { %1443 = vmatpush.msra.mxu2 %v1277_v11  ;;  %1462 = vmatpush.msrb.mxu3 %v1297_v44  ;;  %v1533_v11 = vld [vmem:[%s3976_s6 + $0xf0] sm:$0xff] }
 0x2f1   :  { %1484 = vmatpush.msra.mxu0 %v1314_v17  ;;  %1420 = vmatpush.msrb.mxu1 %v1261_v9  ;;  %v1518_v17 = vld [vmem:[%s3976_s6 + $0x78] sm:$0xff]  ;;  %v1549_v9 = vld [vmem:[%s3976_s6 + $0x170] sm:$0xff] }
 0x2f2   :  { %1444 = vmatpush.msra.mxu2 %v1276_v18  ;;  %1463 = vmatpush.msrb.mxu3 %v1296_v22 }
 0x2f3   :  { %1485 = vmatpush.msra.mxu0 %v1313_v4  ;;  %1421 = vmatpush.msrb.mxu1 %v1260_v23  ;;  %v1532_v4 = vld [vmem:[%s3976_s6 + $0xe8] sm:$0xff]  ;;  %v1517_v23 = vld [vmem:[%s3976_s6 + $0x70] sm:$0xff] }
 0x2f4   :  { %1445 = vmatpush.msra.mxu2 %v1275_v59  ;;  %1464 = vmatpush.msrb.mxu3 %v1295_v38  ;;  %v1548_v59 = vld [vmem:[%s3976_s6 + $0x168] sm:$0xff] }
 0x2f5   :  { %1486 = vmatpush.msra.mxu0 %v1312_v27  ;;  %1422 = vmatpush.msrb.mxu1 %v1259_v28  ;;  %v1531_v27 = vld [vmem:[%s3976_s6 + $0xe0] sm:$0xff] }
 0x2f6   :  { %1446 = vmatpush.msra.mxu2 %v1274_v53  ;;  %1465 = vmatpush.msrb.mxu3 %v1294_v30  ;;  %v1516_v53 = vld [vmem:[%s3976_s6 + $0x68] sm:$0xff]  ;;  %v1547_v30 = vld [vmem:[%s3976_s6 + $0x160] sm:$0xff] }
 0x2f7   :  { %1487 = vmatpush.msra.mxu0 %v1311_v51  ;;  %1423 = vmatpush.msrb.mxu1 %v1258_v26  ;;  %v1084_v26 = vperm.slane %v3299_v24, 5 }
 0x2f8   :  { %1447 = vmatpush.msra.mxu2 %v1273_v57  ;;  %1466 = vmatpush.msrb.mxu3 %v1293_v35  ;;  %v1530_v57 = vld [vmem:[%s3976_s6 + $0xd8] sm:$0xff]  ;;  %v1515_v35 = vld [vmem:[%s3976_s6 + $0x60] sm:$0xff] }
 0x2f9   :  { %1488 = vmatpush.msra.mxu0 %v1310_v15  ;;  %1424 = vmatpush.msrb.mxu1 %v1257_v39  ;;  %v1566_v15 = vld [vmem:[%s3976_s6 + $0x1f8] sm:$0xff] }
 0x2fa   :  { %1448 = vmatpush.msra.mxu2 %v1272_v40  ;;  %1467 = vmatpush.msrb.mxu3 %v1292_v41  ;;  %v1529_v40 = vld [vmem:[%s3976_s6 + $0xd0] sm:$0xff]  ;;  %v1546_v41 = vld [vmem:[%s3976_s6 + $0x158] sm:$0xff] }
 0x2fb   :  { %1489 = vmatpush.msra.mxu0 %v1309_v58  ;;  %1425 = vmatpush.msrb.mxu1 %v1256_v5 }
 0x2fc   :  { %1449 = vmatpush.msra.mxu2 %v1271_v21  ;;  %1468 = vmatpush.msrb.mxu3 %v1291_v8  ;;  %v1514_v21 = vld [vmem:[%s3976_s6 + $0x58] sm:$0xff]  ;;  %v1565_v8 = vld [vmem:[%s3976_s6 + $0x1f0] sm:$0xff] }
 0x2fd   :  { %1490 = vmatpush.msra.mxu0 %v1308_v25  ;;  %1426 = vmatpush.msrb.mxu1 %v1255_v34  ;;  %v1528_v34 = vld [vmem:[%s3976_s6 + $0xc8] sm:$0xff] }
 0x2fe   :  { %1469 = vmatpush.msrb.mxu3 %v1290_v56  ;;  %v1545_v56 = vld [vmem:[%s3976_s6 + $0x150] sm:$0xff] }
 0x2ff   :  { %1491 = vmatpush.msra.mxu0 %v1307_v47  ;;  %v1564_v47 = vld [vmem:[%s3976_s6 + $0x1e8] sm:$0xff] }
 0x300   :  { %1470 = vmatpush.msrb.mxu3 %v1289_v14 }
 0x301   :  { %1492 = vmatpush.msra.mxu0 %v1306_v19  ;;  %v1527_v19 = vld [vmem:[%s3976_s6 + $0xc0] sm:$0xff] }
 0x302   :  { %1471 = vmatpush.msrb.mxu3 %v1288_v16  ;;  %v1512_v16 = vld [vmem:[%s3976_s6 + $0x48] sm:$0xff] }
 0x303   :  { %1493 = vmatpush.msra.mxu0 %v1305_v62 }
 0x304   :  { %1472 = vmatpush.msrb.mxu3 %v1287_v29 }
 0x305   :  { %1494 = vmatpush.msra.mxu0 %v1304_v1  ;;  %v1543_v1 = vld [vmem:[%s3976_s6 + $0x140] sm:$0xff] }
 0x307   :  { %1495 = vmatpush.msra.mxu0 %v1303_v7  ;;  %v1525_v7 = vld [vmem:[%s3976_s6 + $0xb0] sm:$0xff] }
 0x325   :  { %v591_v52 = vpop.f32.mrf.mxu3 }
 0x326   :  { %v495_v37 = vpop.f32.mrf.mxu2  ;;  %v1097_v2 = vadd.f32 %v1081_v45, %v591_v52 }
 0x327   :  { %v1096_v55 = vadd.f32 %v1080_v61, %v495_v37  ;;  %v399_v20 = vpop.f32.mrf.mxu1 }
 0x328   :  { %v1131_v0 = vmul.f32 1.442695, %v1097_v2  ;;  %v1095_v42 = vadd.f32 %v1079_v54, %v399_v20  ;;  %vm1113_vm7 = vcmp.gt.f32.partialorder %v1097_v2, 0.0 }
 0x329   :  { %v1129_v63 = vmul.f32 1.442695, %v1096_v55  ;;  %vm1112_vm6 = vcmp.gt.f32.partialorder %v1096_v55, 0.0 }
 0x32a   :  { %v1127_v3 = vmul.f32 1.442695, %v1095_v42  ;;  %vm1111_vm8 = vcmp.gt.f32.partialorder %v1095_v42, 0.0 }
 0x32b   :  { %2193 = vpow2.f32 %v1129_v63  ;;  %v1085_v63 = vperm.slane %v3299_v24, 6 }
 0x32c   :  { %2195 = vpow2.f32 %v1131_v0  ;;  %v1526_v0 = vld [vmem:[%s3976_s6 + $0xb8] sm:$0xff] }
 0x32d   :  { %2197 = vpow2.f32 %v1127_v3 }
 0x330   :  { %v687_v31 = vpop.f32.mrf.mxu0 }
 0x331   :  { %v1098_v10 = vadd.f32 %v1082_v32, %v687_v31  ;;  %v2194_v50 = vpop.eup %2193  ;;  %v1562_v31 = vld [vmem:[%s3976_s6 + $0x1d8] sm:$0xff] }
 0x332   :  { %v2196_v12 = vpop.eup %2195  ;;  %v2076_v49 = vadd.f32 -1.0, %v2194_v50  ;;  %v1510_v50 = vld [vmem:[%s3976_s6 + $0x38] sm:$0xff] }
 0x333   :  { %v1133_v13 = vmul.f32 1.442695, %v1098_v10  ;;  %v2077_v33 = vadd.f32 -1.0, %v2196_v12  ;;  %v2198_v48 = vpop.eup %2197  ;;  %vm1114_vm9 = vcmp.gt.f32.partialorder %v1098_v10, 0.0  ;;  %v1542_v12 = vld [vmem:[%s3976_s6 + $0x138] sm:$0xff] }
 0x334   :  { %v3364_v43 = vsel %vm1112_vm6, %v1096_v55, %v2076_v49  ;;  %v2075_v6 = vadd.f32 -1.0, %v2198_v48  ;;  %v1544_v55 = vld [vmem:[%s3976_s6 + $0x148] sm:$0xff]  ;;  %v1561_v48 = vld [vmem:[%s3976_s6 + $0x1d0] sm:$0xff] }
 0x335   :  { %2199 = vpow2.f32 %v1133_v13  ;;  %1358 = vmatmul.f32.vlgmr.msrb.gmra.mxu2 %v3364_v43  ;;  %v3370_v36 = vsel %vm1113_vm7, %v1097_v2, %v2077_v33  ;;  %v1083_v33 = vperm.slane %v3299_v24, 4 }
 0x336   :  { %1381 = vmatmul.f32.vlgmr.msra.gmra.mxu3 %v3370_v36  ;;  %v498_v44 = vpop.f32.mrf.mxu2  ;;  %1654 = vmatpush.msrb.mxu2 %v1534_v46  ;;  %v3386_v22 = vsel %vm1111_vm8, %v1095_v42, %v2075_v6  ;;  %v1563_v42 = vld [vmem:[%s3976_s6 + $0x1e0] sm:$0xff]  ;;  %v1524_v46 = vld [vmem:[%s3976_s6 + $0xa8] sm:$0xff]  ;;  %v1509_v6 = vld [vmem:[%s3976_s6 + $0x30] sm:$0xff] }
 0x337   :  { %v3384_v18 = vadd.f32 %v1080_v61, %v498_v44  ;;  %1677 = vmatpush.msra.mxu3 %v1550_v60  ;;  %1335 = vmatmul.f32.vlgmr.msra.gmra.mxu1 %v3386_v22 }
 0x338   :  { %1655 = vmatpush.msrb.mxu2 %v1533_v11  ;;  %1631 = vmatpush.msra.mxu1 %v1518_v17  ;;  %v1541_v11 = vld [vmem:[%s3976_s6 + $0x130] sm:$0xff] }
 0x339   :  { %v1145_v38 = vmul.f32 1.442695, %v3384_v18  ;;  %1678 = vmatpush.msra.mxu3 %v1549_v9  ;;  %vm1120_vm10 = vcmp.gt.f32.partialorder %v3384_v18, 0.0  ;;  %v1523_v9 = vld [vmem:[%s3976_s6 + $0xa0] sm:$0xff] }
 0x33a   :  { %1656 = vmatpush.msrb.mxu2 %v1532_v4  ;;  %1632 = vmatpush.msra.mxu1 %v1517_v23 }
 0x33b   :  { %v2200_v28 = vpop.eup %2199  ;;  %2201 = vpow2.f32 %v1145_v38  ;;  %1679 = vmatpush.msra.mxu3 %v1548_v59  ;;  %v1508_v38 = vld [vmem:[%s3976_s6 + $0x28] sm:$0xff] }
 0x33c   :  { %v2078_v51 = vadd.f32 -1.0, %v2200_v28  ;;  %1657 = vmatpush.msrb.mxu2 %v1531_v27  ;;  %1633 = vmatpush.msra.mxu1 %v1516_v53  ;;  %v1559_v53 = vld [vmem:[%s3976_s6 + $0x1c0] sm:$0xff] }
 0x33d   :  { %1680 = vmatpush.msra.mxu3 %v1547_v30 }
 0x33e   :  { %v3418_v39 = vsel %vm1114_vm9, %v1098_v10, %v2078_v51  ;;  %v879_v5 = vpop.f32.mrf.mxu2  ;;  %1658 = vmatpush.msrb.mxu2 %v1530_v57  ;;  %1634 = vmatpush.msra.mxu1 %v1515_v35  ;;  %v1507_v57 = vld [vmem:[%s3976_s6 + $0x20] sm:$0xff]  ;;  %v1522_v35 = vld [vmem:[%s3976_s6 + $0x98] sm:$0xff] }
 0x33f   :  { %v594_v58 = vpop.f32.mrf.mxu3  ;;  %1404 = vmatmul.f32.vlgmr.msrb.gmra.mxu0 %v3418_v39  ;;  %v3439_v61 = vadd.f32 %v1084_v26, %v879_v5  ;;  %1681 = vmatpush.msra.mxu3 %v1546_v41 }
 0x340   :  { %v3435_v25 = vadd.f32 %v1081_v45, %v594_v58  ;;  %1700 = vmatpush.msrb.mxu0 %v1566_v15  ;;  %1659 = vmatpush.msrb.mxu2 %v1529_v40  ;;  %v1513_v45 = vld [vmem:[%s3976_s6 + $0x50] sm:$0xff]  ;;  %v1086_v15 = vperm.slane %v3299_v24, 7  ;;  %v1536_v24 = vld [vmem:[%s3976_s6 + $0x108] sm:$0xff] }
 0x341   :  { %v2202_v37 = vpop.eup %2201  ;;  %v1137_v14 = vmul.f32 1.442695, %v3439_v61  ;;  %1635 = vmatpush.msra.mxu1 %v1514_v21  ;;  %v402_v2 = vpop.f32.mrf.mxu1  ;;  %1682 = vmatpush.msra.mxu3 %v1545_v56  ;;  %vm1116_vm12 = vcmp.gt.f32.partialorder %v3439_v61, 0.0  ;;  %v1558_v21 = vld [vmem:[%s3976_s6 + $0x1b8] sm:$0xff] }
 0x342   :  { %v1147_v52 = vmul.f32 1.442695, %v3435_v25  ;;  %1701 = vmatpush.msrb.mxu0 %v1565_v8  ;;  %1660 = vmatpush.msrb.mxu2 %v1528_v34  ;;  %v2084_v20 = vadd.f32 -1.0, %v2202_v37  ;;  %v3466_v62 = vadd.f32 %v1079_v54, %v402_v2  ;;  %v1511_v54 = vld [vmem:[%s3976_s6 + $0x40] sm:$0xff]  ;;  %vm1121_vm11 = vcmp.gt.f32.partialorder %v3435_v25, 0.0  ;;  %v1540_v8 = vld [vmem:[%s3976_s6 + $0x128] sm:$0xff] }
 0x343   :  { %1636 = vmatpush.msra.mxu1 %v1513_v45  ;;  %1683 = vmatpush.msra.mxu3 %v1544_v55  ;;  %v1506_v56 = vld [vmem:[%s3976_s6 + $0x18] sm:$0xff]  ;;  %v1557_v45 = vld [vmem:[%s3976_s6 + $0x1b0] sm:$0xff]  ;;  %v1556_v2 = vld [vmem:[%s3976_s6 + $0x1a8] sm:$0xff] }
 0x344   :  { %2203 = vpow2.f32 %v1147_v52  ;;  %1702 = vmatpush.msrb.mxu0 %v1564_v47  ;;  %v3477_v29 = vsel %vm1120_vm10, %v3384_v18, %v2084_v20  ;;  %1661 = vmatpush.msrb.mxu2 %v1527_v19  ;;  %v1143_v3 = vmul.f32 1.442695, %v3466_v62  ;;  %vm1119_vm13 = vcmp.gt.f32.partialorder %v3466_v62, 0.0  ;;  %v1520_v52 = vld [vmem:[%s3976_s6 + $0x88] sm:$0xff]  ;;  %v1505_v55 = vld [vmem:[%s3976_s6 + $0x10] sm:$0xff] }
 0x345   :  { %2205 = vpow2.f32 %v1137_v14  ;;  %1361 = vmatmul.f32.gmra.mxu2 %v3477_v29  ;;  %1637 = vmatpush.msra.mxu1 %v1512_v16  ;;  %v1539_v14 = vld [vmem:[%s3976_s6 + $0x120] sm:$0xff] }
 0x346   :  { %1662 = vmatpush.msrb.mxu2 %v1526_v0  ;;  %1703 = vmatpush.msrb.mxu0 %v1563_v42  ;;  %2207 = vpow2.f32 %v1143_v3  ;;  %v1519_v42 = vld [vmem:[%s3976_s6 + $0x80] sm:$0xff] }
 0x347   :  { %v975_v10 = vpop.f32.mrf.mxu3  ;;  %1638 = vmatpush.msra.mxu1 %v1511_v54  ;;  %1684 = vmatpush.msra.mxu3 %v1543_v1  ;;  %v1504_v1 = vld [vmem:[%s3976_s6 + $0x8] sm:$0xff] }
 0x348   :  { %v3501_v49 = vadd.f32 %v1085_v63, %v975_v10  ;;  %v690_v13 = vpop.f32.mrf.mxu0  ;;  %1663 = vmatpush.msrb.mxu2 %v1525_v7  ;;  %1704 = vmatpush.msrb.mxu0 %v1562_v31  ;;  %v1598_v7 = vld [vmem:[%s3976_s6 + $0x2f8] sm:$0xff] }
 0x349   :  { %v3512_v60 = vadd.f32 %v1082_v32, %v690_v13  ;;  %1639 = vmatpush.msra.mxu1 %v1510_v50  ;;  %v1560_v32 = vld [vmem:[%s3976_s6 + $0x1c8] sm:$0xff]  ;;  %1685 = vmatpush.msra.mxu3 %v1542_v12  ;;  %v783_v23 = vpop.f32.mrf.mxu1  ;;  %v1538_v12 = vld [vmem:[%s3976_s6 + $0x118] sm:$0xff] }
 0x34a   :  { %v2204_v44 = vpop.eup %2203  ;;  %v1139_v17 = vmul.f32 1.442695, %v3501_v49  ;;  %1664 = vmatpush.msrb.mxu2 %v1524_v46  ;;  %1705 = vmatpush.msrb.mxu0 %v1561_v48  ;;  %v3533_v28 = vadd.f32 %v1083_v33, %v783_v23  ;;  %vm1117_vm14 = vcmp.gt.f32.partialorder %v3501_v49, 0.0  ;;  %v1555_v46 = vld [vmem:[%s3976_s6 + $0x1a0] sm:$0xff]  ;;  %v1596_v23 = vld [vmem:[%s3976_s6 + $0x2e8] sm:$0xff] }
 0x34b   :  { %v2206_v18 = vpop.eup %2205  ;;  %v1149_v4 = vmul.f32 1.442695, %v3512_v60  ;;  %v2085_v59 = vadd.f32 -1.0, %v2204_v44  ;;  %1640 = vmatpush.msra.mxu1 %v1509_v6  ;;  %1686 = vmatpush.msra.mxu3 %v1541_v11  ;;  %vm1122_vm15 = vcmp.gt.f32.partialorder %v3512_v60, 0.0  ;;  %v1597_v11 = vld [vmem:[%s3976_s6 + $0x2f0] sm:$0xff] }
 0x34c   :  { %v2080_v27 = vadd.f32 -1.0, %v2206_v18  ;;  %2209 = vpow2.f32 %v1139_v17  ;;  %1665 = vmatpush.msrb.mxu2 %v1523_v9  ;;  %1706 = vmatpush.msrb.mxu0 %v1560_v32  ;;  %v2208_v40 = vpop.eup %2207  ;;  %v1135_v41 = vmul.f32 1.442695, %v3533_v28  ;;  %vm1115_vm1 = vcmp.gt.f32.partialorder %v3533_v28, 0.0  ;;  %v1582_v17 = vld [vmem:[%s3976_s6 + $0x278] sm:$0xff]  ;;  %v1537_v9 = vld [vmem:[%s3976_s6 + $0x110] sm:$0xff] }
 0x34d   :  { %2211 = vpow2.f32 %v1149_v4  ;;  %v3541_v30 = vsel %vm1121_vm11, %v3435_v25, %v2085_v59  ;;  %v882_v51 = vpop.f32.mrf.mxu2  ;;  %1641 = vmatpush.msra.mxu1 %v1508_v38  ;;  %v2083_v25 = vadd.f32 -1.0, %v2208_v40  ;;  %1687 = vmatpush.msra.mxu3 %v1540_v8  ;;  %v1554_v4 = vld [vmem:[%s3976_s6 + $0x198] sm:$0xff]  ;;  %v1581_v38 = vld [vmem:[%s3976_s6 + $0x270] sm:$0xff]  ;;  %v1535_v40 = vld [vmem:[%s3976_s6 + $0x100] sm:$0xff] }
 0x34e   :  { %1384 = vmatmul.f32.gmra.mxu3 %v3541_v30  ;;  %v3553_v58 = vsel %vm1116_vm12, %v3439_v61, %v2080_v27  ;;  %v3557_v5 = vadd.f32 %v1084_v26, %v882_v51  ;;  %1707 = vmatpush.msrb.mxu0 %v1559_v53  ;;  %v1521_v61 = vld [vmem:[%s3976_s6 + $0x90] sm:$0xff]  ;;  %2213 = vpow2.f32 %v1135_v41  ;;  %v1595_v51 = vld [vmem:[%s3976_s6 + $0x2e0] sm:$0xff]  ;;  %v1552_v41 = vld [vmem:[%s3976_s6 + $0x188] sm:$0xff] }
 0x34f   :  { %1450 = vmatmul.f32.vlgmr.msra.gmra.mxu2 %v3553_v58  ;;  %1642 = vmatpush.msra.mxu1 %v1507_v57  ;;  %v3578_v47 = vsel %vm1119_vm13, %v3466_v62, %v2083_v25  ;;  %v1553_v53 = vld [vmem:[%s3976_s6 + $0x190] sm:$0xff]  ;;  %v1579_v8 = vld [vmem:[%s3976_s6 + $0x260] sm:$0xff]  ;;  %v1614_v25 = vld [vmem:[%s3976_s6 + $0x378] sm:$0xff] }
 0x350   :  { %v1153_v26 = vmul.f32 1.442695, %v3557_v5  ;;  %1666 = vmatpush.msrb.mxu2 %v1522_v35  ;;  %1708 = vmatpush.msrb.mxu0 %v1558_v21  ;;  %vm1124_vm2 = vcmp.gt.f32.partialorder %v3557_v5, 0.0  ;;  %v1580_v35 = vld [vmem:[%s3976_s6 + $0x268] sm:$0xff] }
 0x351   :  { %v1071_v34 = vpop.f32.mrf.mxu0  ;;  %1338 = vmatmul.f32.gmra.mxu1 %v3578_v47  ;;  %1688 = vmatpush.msra.mxu3 %v1539_v14  ;;  %v1593_v14 = vld [vmem:[%s3976_s6 + $0x2d0] sm:$0xff] }
 0x352   :  { %v3582_v37 = vadd.f32 %v1086_v15, %v1071_v34  ;;  %v2210_v19 = vpop.eup %2209  ;;  %2215 = vpow2.f32 %v1153_v26  ;;  %1667 = vmatpush.msrb.mxu2 %v1521_v61  ;;  %v786_v62 = vpop.f32.mrf.mxu1  ;;  %1643 = vmatpush.msra.mxu1 %v1506_v56  ;;  %v1578_v56 = vld [vmem:[%s3976_s6 + $0x258] sm:$0xff] }
 0x353   :  { %v2212_v20 = vpop.eup %2211  ;;  %v2081_v16 = vadd.f32 -1.0, %v2210_v19  ;;  %1709 = vmatpush.msrb.mxu0 %v1557_v45  ;;  %v3604_v54 = vadd.f32 %v1083_v33, %v786_v62  ;;  %1689 = vmatpush.msra.mxu3 %v1538_v12  ;;  %v1630_v19 = vld [vmem:[%s3976_s6 + $0x3f8] sm:$0xff]  ;;  %v1612_v62 = vld [vmem:[%s3976_s6 + $0x368] sm:$0xff]  ;;  %v1575_v12 = vld [vmem:[%s3976_s6 + $0x240] sm:$0xff] }
 0x354   :  { %v1141_v0 = vmul.f32 1.442695, %v3582_v37  ;;  %1668 = vmatpush.msrb.mxu2 %v1520_v52  ;;  %v2086_v31 = vadd.f32 -1.0, %v2212_v20  ;;  %1644 = vmatpush.msra.mxu1 %v1505_v55  ;;  %v2214_v13 = vpop.eup %2213  ;;  %vm1118_vm3 = vcmp.gt.f32.partialorder %v3582_v37, 0.0  ;;  %v1551_v52 = vld [vmem:[%s3976_s6 + $0x180] sm:$0xff]  ;;  %v1592_v20 = vld [vmem:[%s3976_s6 + $0x2c8] sm:$0xff] }
 0x355   :  { %v3613_v10 = vsel %vm1117_vm14, %v3501_v49, %v2081_v16  ;;  %1710 = vmatpush.msrb.mxu0 %v1556_v2  ;;  %v1151_v33 = vmul.f32 1.442695, %v3604_v54  ;;  %v2079_v48 = vadd.f32 -1.0, %v2214_v13  ;;  %1690 = vmatpush.msra.mxu3 %v1537_v9  ;;  %vm1123_vm4 = vcmp.gt.f32.partialorder %v3604_v54, 0.0  ;;  %v1577_v2 = vld [vmem:[%s3976_s6 + $0x250] sm:$0xff]  ;;  %v1590_v13 = vld [vmem:[%s3976_s6 + $0x2b8] sm:$0xff] }
 0x356   :  { %v978_v3 = vpop.f32.mrf.mxu3  ;;  %2217 = vpow2.f32 %v1141_v0  ;;  %1473 = vmatmul.f32.vlgmr.msrb.gmra.mxu3 %v3613_v10  ;;  %1669 = vmatpush.msrb.mxu2 %v1519_v42  ;;  %v3626_v49 = vsel %vm1122_vm15, %v3512_v60, %v2086_v31  ;;  %v1629_v0 = vld [vmem:[%s3976_s6 + $0x3f0] sm:$0xff]  ;;  %v1576_v42 = vld [vmem:[%s3976_s6 + $0x248] sm:$0xff]  ;;  %v1587_v9 = vld [vmem:[%s3976_s6 + $0x2a0] sm:$0xff] }
 0x357   :  { %v3617_v50 = vadd.f32 %v1085_v63, %v978_v3  ;;  %v1503_v63 = vld [vmem:[%s3976_s6] sm:$0xff]  ;;  %1645 = vmatpush.msra.mxu1 %v1504_v1  ;;  %2219 = vpow2.f32 %v1151_v33  ;;  %1407 = vmatmul.f32.gmra.mxu0 %v3626_v49  ;;  %v3647_v32 = vsel %vm1115_vm1, %v3533_v28, %v2079_v48  ;;  %v1628_v3 = vld [vmem:[%s3976_s6 + $0x3e8] sm:$0xff]  ;;  %v1610_v33 = vld [vmem:[%s3976_s6 + $0x358] sm:$0xff] }
 0x358   :  { %1746 = vmatpush.msra.mxu2 %v1598_v7  ;;  %v2216_v44 = vpop.eup %2215  ;;  %1711 = vmatpush.msrb.mxu0 %v1555_v46  ;;  %v1611_v1 = vld [vmem:[%s3976_s6 + $0x360] sm:$0xff]  ;;  %v1574_v46 = vld [vmem:[%s3976_s6 + $0x238] sm:$0xff]  ;;  %v1589_v48 = vld [vmem:[%s3976_s6 + $0x2b0] sm:$0xff] }
 0x359   :  { %v1155_v6 = vmul.f32 1.442695, %v3617_v50  ;;  %v1074_v60 = vpop.f32.mrf.mxu0  ;;  %1646 = vmatpush.msra.mxu1 %v1503_v63  ;;  %v2088_v59 = vadd.f32 -1.0, %v2216_v44  ;;  %1691 = vmatpush.msra.mxu3 %v1536_v24  ;;  %vm1125_vm5 = vcmp.gt.f32.partialorder %v3617_v50, 0.0  ;;  %v1588_v44 = vld [vmem:[%s3976_s6 + $0x2a8] sm:$0xff]  ;;  %v1623_v24 = vld [vmem:[%s3976_s6 + $0x3c0] sm:$0xff] }
 0x35a   :  { %v3651_v18 = vadd.f32 %v1086_v15, %v1074_v60  ;;  %1427 = vmatmul.f32.vlgmr.msrb.gmra.mxu1 %v3647_v32  ;;  %1747 = vmatpush.msra.mxu2 %v1597_v11  ;;  %v1573_v11 = vld [vmem:[%s3976_s6 + $0x230] sm:$0xff]  ;;  %v1608_v60 = vld [vmem:[%s3976_s6 + $0x348] sm:$0xff] }
 0x35b   :  { %2221 = vpow2.f32 %v1155_v6  ;;  %1723 = vmatpush.msrb.mxu1 %v1582_v17  ;;  %1712 = vmatpush.msrb.mxu0 %v1554_v4  ;;  %v3678_v15 = vsel %vm1124_vm2, %v3557_v5, %v2088_v59  ;;  %v1594_v5 = vld [vmem:[%s3976_s6 + $0x2d8] sm:$0xff]  ;;  %v1609_v6 = vld [vmem:[%s3976_s6 + $0x350] sm:$0xff]  ;;  %v1624_v4 = vld [vmem:[%s3976_s6 + $0x3c8] sm:$0xff] }
 0x35c   :  { %v2218_v27 = vpop.eup %2217  ;;  %v1157_v28 = vmul.f32 1.442695, %v3651_v18  ;;  %1748 = vmatpush.msra.mxu2 %v1596_v23  ;;  %1692 = vmatpush.msra.mxu3 %v1535_v40  ;;  %vm1126_vm6 = vcmp.gt.f32.partialorder %v3651_v18, 0.0  ;;  %v1625_v17 = vld [vmem:[%s3976_s6 + $0x3d0] sm:$0xff]  ;;  %v1571_v23 = vld [vmem:[%s3976_s6 + $0x220] sm:$0xff]  ;;  %v1586_v59 = vld [vmem:[%s3976_s6 + $0x298] sm:$0xff] }
 0x35d   :  { %v2082_v57 = vadd.f32 -1.0, %v2218_v27  ;;  %1724 = vmatpush.msrb.mxu1 %v1581_v38  ;;  %v2220_v21 = vpop.eup %2219  ;;  %1713 = vmatpush.msrb.mxu0 %v1553_v53  ;;  %v1606_v38 = vld [vmem:[%s3976_s6 + $0x338] sm:$0xff]  ;;  %v1605_v53 = vld [vmem:[%s3976_s6 + $0x330] sm:$0xff]  ;;  %v1603_v40 = vld [vmem:[%s3976_s6 + $0x320] sm:$0xff] }
 0x35e   :  { %2223 = vpow2.f32 %v1157_v28  ;;  %1749 = vmatpush.msra.mxu2 %v1595_v51  ;;  %v2087_v61 = vadd.f32 -1.0, %v2220_v21  ;;  %1769 = vmatpush.msrb.mxu3 %v1614_v25  ;;  %v1570_v27 = vld [vmem:[%s3976_s6 + $0x218] sm:$0xff]  ;;  %v1585_v28 = vld [vmem:[%s3976_s6 + $0x290] sm:$0xff]  ;;  %v1584_v51 = vld [vmem:[%s3976_s6 + $0x288] sm:$0xff] }
 0x35f   :  { %1725 = vmatpush.msrb.mxu1 %v1580_v35  ;;  %1453 = vmatmul.f32.gmra.mxu2 %v3678_v15  ;;  %v3699_v34 = vsel %vm1118_vm3, %v3582_v37, %v2082_v57  ;;  %v1613_v37 = vld [vmem:[%s3976_s6 + $0x370] sm:$0xff]  ;;  %v1604_v57 = vld [vmem:[%s3976_s6 + $0x328] sm:$0xff]  ;;  %v1583_v35 = vld [vmem:[%s3976_s6 + $0x280] sm:$0xff] }
 0x360   :  { %1714 = vmatpush.msrb.mxu0 %v1552_v41  ;;  %1750 = vmatpush.msra.mxu2 %v1594_v5  ;;  %v3705_v45 = vsel %vm1123_vm4, %v3604_v54, %v2087_v61  ;;  %v1591_v54 = vld [vmem:[%s3976_s6 + $0x2c0] sm:$0xff]  ;;  %v1620_v41 = vld [vmem:[%s3976_s6 + $0x3a8] sm:$0xff]  ;;  %v1601_v25 = vld [vmem:[%s3976_s6 + $0x310] sm:$0xff]  ;;  %vm2023_vm4 = vcmask 25600  }
 0x361   :  { %v2222_v26 = vpop.eup %2221  ;;  %1726 = vmatpush.msrb.mxu1 %v1579_v8  ;;  %1496 = vmatmul.f32.vlgmr.msra.gmra.mxu0 %v3699_v34  ;;  %v1567_v21 = vld [vmem:[%s3976_s6 + $0x200] sm:$0xff]  ;;  %v1602_v8 = vld [vmem:[%s3976_s6 + $0x318] sm:$0xff] }
 0x362   :  { %1430 = vmatmul.f32.gmra.mxu1 %v3705_v45  ;;  %v2089_v16 = vadd.f32 -1.0, %v2222_v26  ;;  %1715 = vmatpush.msrb.mxu0 %v1551_v52  ;;  %v1619_v5 = vld [vmem:[%s3976_s6 + $0x3a0] sm:$0xff]  ;;  %v1618_v61 = vld [vmem:[%s3976_s6 + $0x398] sm:$0xff]  ;;  %v1600_v26 = vld [vmem:[%s3976_s6 + $0x308] sm:$0xff] }
 0x363   :  { %1727 = vmatpush.msrb.mxu1 %v1578_v56  ;;  %1751 = vmatpush.msra.mxu2 %v1593_v14 }
 0x364   :  { %v2224_v55 = vpop.eup %2223  ;;  %1770 = vmatpush.msrb.mxu3 %v1613_v37  ;;  %1792 = vmatpush.msra.mxu0 %v1630_v19  ;;  %v3747_v31 = vsel %vm1125_vm5, %v3617_v50, %v2089_v16  ;;  %v1627_v50 = vld [vmem:[%s3976_s6 + $0x3e0] sm:$0xff] }
 0x365   :  { %1728 = vmatpush.msrb.mxu1 %v1577_v2  ;;  %1752 = vmatpush.msra.mxu2 %v1592_v20  ;;  %v2090_v7 = vadd.f32 -1.0, %v2224_v55 }
 0x366   :  { %1771 = vmatpush.msrb.mxu3 %v1612_v62  ;;  %1793 = vmatpush.msra.mxu0 %v1629_v0 }
 0x367   :  { %1729 = vmatpush.msrb.mxu1 %v1576_v42  ;;  %1753 = vmatpush.msra.mxu2 %v1591_v54  ;;  %v3765_v63 = vsel %vm1126_vm6, %v3651_v18, %v2090_v7  ;;  %v1607_v18 = vld [vmem:[%s3976_s6 + $0x340] sm:$0xff] }
 0x368   :  { %1772 = vmatpush.msrb.mxu3 %v1611_v1  ;;  %1794 = vmatpush.msra.mxu0 %v1628_v3 }
 0x369   :  { %1476 = vmatmul.f32.gmra.mxu3 %v3747_v31  ;;  %1670 = vmatmul.f32.vlgmr.msrb.gmra.mxu2 %v3364_v43  ;;  %v1626_v43 = vld [vmem:[%s3976_s6 + $0x3d8] sm:$0xff] }
 0x36a   :  { %1730 = vmatpush.msrb.mxu1 %v1575_v12  ;;  %1754 = vmatpush.msra.mxu2 %v1590_v13 }
 0x36b   :  { %1773 = vmatpush.msrb.mxu3 %v1610_v33  ;;  %1795 = vmatpush.msra.mxu0 %v1627_v50 }
 0x36c   :  { %1499 = vmatmul.f32.gmra.mxu0 %v3765_v63  ;;  %1647 = vmatmul.f32.vlgmr.msra.gmra.mxu1 %v3386_v22  ;;  %v1572_v22 = vld [vmem:[%s3976_s6 + $0x228] sm:$0xff] }
 0x36d   :  { %1731 = vmatpush.msrb.mxu1 %v1574_v46  ;;  %1755 = vmatpush.msra.mxu2 %v1589_v48 }
 0x36e   :  { %1774 = vmatpush.msrb.mxu3 %v1609_v6  ;;  %1796 = vmatpush.msra.mxu0 %v1626_v43  ;;  %v2273_v6 = vmov 1  }
 0x36f   :  { %1732 = vmatpush.msrb.mxu1 %v1573_v11  ;;  %1756 = vmatpush.msra.mxu2 %v1588_v44 }
 0x370   :  { %1775 = vmatpush.msrb.mxu3 %v1608_v60  ;;  %1797 = vmatpush.msra.mxu0 %v1625_v17 }
 0x371   :  { %1733 = vmatpush.msrb.mxu1 %v1572_v22  ;;  %1757 = vmatpush.msra.mxu2 %v1587_v9 }
 0x372   :  { %1776 = vmatpush.msrb.mxu3 %v1607_v18  ;;  %1798 = vmatpush.msra.mxu0 %v1624_v4 }
 0x373   :  { %1673 = vmatmul.f32.gmra.mxu2 %v3477_v29  ;;  %1693 = vmatmul.f32.vlgmr.msra.gmra.mxu3 %v3370_v36  ;;  %v1622_v36 = vld [vmem:[%s3976_s6 + $0x3b8] sm:$0xff]  ;;  %v1569_v29 = vld [vmem:[%s3976_s6 + $0x210] sm:$0xff] }
 0x374   :  { %1734 = vmatpush.msrb.mxu1 %v1571_v23  ;;  %1758 = vmatpush.msra.mxu2 %v1586_v59 }
 0x375   :  { %1777 = vmatpush.msrb.mxu3 %v1606_v38  ;;  %1799 = vmatpush.msra.mxu0 %v1623_v24 }
 0x376   :  { %1650 = vmatmul.f32.gmra.mxu1 %v3578_v47  ;;  %1716 = vmatmul.f32.vlgmr.msrb.gmra.mxu0 %v3418_v39  ;;  %v1621_v47 = vld [vmem:[%s3976_s6 + $0x3b0] sm:$0xff]  ;;  %v1568_v39 = vld [vmem:[%s3976_s6 + $0x208] sm:$0xff] }
 0x377   :  { %1735 = vmatpush.msrb.mxu1 %v1570_v27  ;;  %1759 = vmatpush.msra.mxu2 %v1585_v28 }
 0x378   :  { %1778 = vmatpush.msrb.mxu3 %v1605_v53  ;;  %1800 = vmatpush.msra.mxu0 %v1622_v36 }
 0x379   :  { %1736 = vmatpush.msrb.mxu1 %v1569_v29  ;;  %1760 = vmatpush.msra.mxu2 %v1584_v51 }
 0x37a   :  { %1779 = vmatpush.msrb.mxu3 %v1604_v57  ;;  %1801 = vmatpush.msra.mxu0 %v1621_v47 }
 0x37b   :  { %1737 = vmatpush.msrb.mxu1 %v1568_v39  ;;  %1761 = vmatpush.msra.mxu2 %v1583_v35 }
 0x37c   :  { %1780 = vmatpush.msrb.mxu3 %v1603_v40  ;;  %1802 = vmatpush.msra.mxu0 %v1620_v41 }
 0x37d   :  { %1696 = vmatmul.f32.gmra.mxu3 %v3541_v30  ;;  %1762 = vmatmul.f32.vlgmr.msra.gmra.mxu2 %v3553_v58  ;;  %v1617_v30 = vld [vmem:[%s3976_s6 + $0x390] sm:$0xff]  ;;  %v1599_v58 = vld [vmem:[%s3976_s6 + $0x300] sm:$0xff] }
 0x37e   :  { %1738 = vmatpush.msrb.mxu1 %v1567_v21  ;;  %1781 = vmatpush.msrb.mxu3 %v1602_v8 }
 0x37f   :  { %1803 = vmatpush.msra.mxu0 %v1619_v5  ;;  %1739 = vmatmul.f32.vlgmr.msrb.gmra.mxu1 %v3647_v32  ;;  %v1616_v32 = vld [vmem:[%s3976_s6 + $0x388] sm:$0xff] }
 0x380   :  { %1719 = vmatmul.f32.gmra.mxu0 %v3626_v49  ;;  %1782 = vmatpush.msrb.mxu3 %v1601_v25  ;;  %v1615_v49 = vld [vmem:[%s3976_s6 + $0x380] sm:$0xff] }
 0x381   :  { %1804 = vmatpush.msra.mxu0 %v1618_v61  ;;  %2124 = vset.pattern.permute.xlu1 %v2273_v6 }
 0x382   :  { %1783 = vmatpush.msrb.mxu3 %v1600_v26  ;;  %2125 = vset.pattern.permute.xlu2 %v2273_v6 }
 0x383   :  { %1805 = vmatpush.msra.mxu0 %v1617_v30 }
 0x384   :  { %1784 = vmatpush.msrb.mxu3 %v1599_v58 }
 0x385   :  { %1806 = vmatpush.msra.mxu0 %v1616_v32  ;;  %1765 = vmatmul.f32.gmra.mxu2 %v3678_v15 }
 0x386   :  { %1785 = vmatmul.f32.vlgmr.msrb.gmra.mxu3 %v3613_v10 }
 0x387   :  { %1807 = vmatpush.msra.mxu0 %v1615_v49  ;;  %1742 = vmatmul.f32.gmra.mxu1 %v3705_v45 }
 0x388   :  { %1808 = vmatmul.f32.vlgmr.msra.gmra.mxu0 %v3699_v34 }
 0x38e   :  { %1788 = vmatmul.f32.gmra.mxu3 %v3747_v31 }
 0x390   :  { %1811 = vmatmul.f32.gmra.mxu0 %v3765_v63 }
 0x3b4   :  { %v1336_v56 = vpop.f32.mrf.mxu1 }
 0x3b8   :  { %v1359_v52 = vpop.f32.mrf.mxu2 }
 0x3b9   :  { %v1382_v19 = vpop.f32.mrf.mxu3  ;;  %v1360_v16 = vadd.f32 %v1359_v52, %v1336_v56 }
 0x3bb   :  { %v1383_v62 = vadd.f32 %v1382_v19, %v1360_v16  ;;  %v2238_v16 = vld [vmem:[%s3971_s1 + $0x8] sm:$0xff] }
 0x3bc   :  { %v1405_v14 = vpop.f32.mrf.mxu0 }
 0x3bd   :  { %v1406_v54 = vadd.f32 %v1405_v14, %v1383_v62 }
 0x3c8   :  { %v1362_v55 = vpop.f32.mrf.mxu2 }
 0x3ce   :  { %v1339_v37 = vpop.f32.mrf.mxu1 }
 0x3cf   :  { %v1363_v45 = vadd.f32 %v1362_v55, %v1339_v37 }
 0x3d1   :  { %v1385_v15 = vpop.f32.mrf.mxu3 }
 0x3d2   :  { %v1451_v10 = vpop.f32.mrf.mxu2  ;;  %v1386_v1 = vadd.f32 %v1385_v15, %v1363_v45 }
 0x3d4   :  { %v1408_v2 = vpop.f32.mrf.mxu0 }
 0x3d5   :  { %v1409_v7 = vadd.f32 %v1408_v2, %v1386_v1 }
 0x3d7   :  { %v1428_v20 = vpop.f32.mrf.mxu1 }
 0x3d8   :  { %v1429_v31 = vadd.f32 %v1428_v20, %v1406_v54  ;;  %v2237_v20 = vld [vmem:[%s3971_s1] sm:$0xff] }
 0x3d9   :  { %v1474_v34 = vpop.f32.mrf.mxu3 }
 0x3da   :  { %v1452_v13 = vadd.f32 %v1451_v10, %v1429_v31 }
 0x3dc   :  { %v1475_v43 = vadd.f32 %v1474_v34, %v1452_v13 }
 0x3de   :  { %v1497_v0 = vpop.f32.mrf.mxu0 }
 0x3df   :  { %v1431_v42 = vpop.f32.mrf.mxu1  ;;  %v1498_v60 = vadd.f32 %v1497_v0, %v1475_v43 }
 0x3e0   :  { %v1432_v12 = vadd.f32 %v1431_v42, %v1409_v7 }
 0x3e2   :  { %v1454_v3 = vpop.f32.mrf.mxu2 }
 0x3e3   :  { %v1455_v33 = vadd.f32 %v1454_v3, %v1432_v12 }
 0x3e9   :  { %v1500_v50 = vpop.f32.mrf.mxu0  ;;  %v1648_v46 = vpop.f32.mrf.mxu1 }
 0x3ec   :  { %v1477_v63 = vpop.f32.mrf.mxu3  ;;  %v1671_v44 = vpop.f32.mrf.mxu2 }
 0x3ed   :  { %v1478_v48 = vadd.f32 %v1477_v63, %v1455_v33  ;;  %v1672_v4 = vadd.f32 %v1671_v44, %v1648_v46 }
 0x3ef   :  { %v1501_v11 = vadd.f32 %v1500_v50, %v1478_v48 }
 0x3f1   :  { %1940 = vmatpush.msra.mxu1 %v1501_v11 }
 0x3f3   :  { %1941 = vmatpush.msra.mxu1 %v1498_v60  ;;  %v1717_v17 = vpop.f32.mrf.mxu0  ;;  %v1651_v9 = vpop.f32.mrf.mxu1 }
 0x3f6   :  { %v1694_v22 = vpop.f32.mrf.mxu3  ;;  %v1674_v18 = vpop.f32.mrf.mxu2 }
 0x3f7   :  { %v1695_v23 = vadd.f32 %v1694_v22, %v1672_v4  ;;  %v1675_v53 = vadd.f32 %v1674_v18, %v1651_v9 }
 0x3f9   :  { %v1718_v27 = vadd.f32 %v1717_v17, %v1695_v23 }
 0x3fc   :  { %v1740_v24 = vpop.f32.mrf.mxu1 }
 0x3fd   :  { %v1720_v59 = vpop.f32.mrf.mxu0  ;;  %v1741_v36 = vadd.f32 %v1740_v24, %v1718_v27 }
 0x400   :  { %v1697_v38 = vpop.f32.mrf.mxu3  ;;  %v1763_v28 = vpop.f32.mrf.mxu2 }
 0x401   :  { %v1698_v29 = vadd.f32 %v1697_v38, %v1675_v53  ;;  %v1764_v51 = vadd.f32 %v1763_v28, %v1741_v36 }
 0x403   :  { %v1721_v39 = vadd.f32 %v1720_v59, %v1698_v29 }
 0x404   :  { %v1743_v40 = vpop.f32.mrf.mxu1 }
 0x405   :  { %v1809_v57 = vpop.f32.mrf.mxu0  ;;  %v1744_v8 = vadd.f32 %v1743_v40, %v1721_v39  ;;  %v1995_v39 = vld [vmem:[%s3979_s9 + $0x60] sm:$0xff] }
 0x408   :  { %v1766_v21 = vpop.f32.mrf.mxu2 }
 0x409   :  { %v1786_v47 = vpop.f32.mrf.mxu3  ;;  %v1767_v5 = vadd.f32 %v1766_v21, %v1744_v8  ;;  %v1993_v21 = vld [vmem:[%s3979_s9 + $0x50] sm:$0xff] }
 0x40a   :  { %v1787_v35 = vadd.f32 %v1786_v47, %v1764_v51  ;;  %v1998_v51 = vld [vmem:[%s3979_s9 + $0x78] sm:$0xff]  ;;  %v1996_v47 = vld [vmem:[%s3979_s9 + $0x68] sm:$0xff] }
 0x40b   :  { %2003 = vmatpush.msra.mxu3 %v1998_v51 }
 0x40c   :  { %v1810_v41 = vadd.f32 %v1809_v57, %v1787_v35  ;;  %v1997_v57 = vld [vmem:[%s3979_s9 + $0x70] sm:$0xff]  ;;  %v2127_v35 = vld [vmem:[%s3977_s7] ss:$0 sm:$0xff] }
 0x40d   :  { %v1812_v26 = vpop.f32.mrf.mxu0  ;;  %2004 = vmatpush.msra.mxu3 %v1997_v57 }
 0x40e   :  { %1815 = vxpose.xlu0.b32.start [1/2] (short) (narrow) %v1810_v41, 8  ;;  %1849 = vperm.xlu1 %2124, %v1810_v41   ;;  %v1994_v41 = vld [vmem:[%s3979_s9 + $0x58] sm:$0xff] }
 0x40f   :  { %2005 = vmatpush.msra.mxu3 %v1996_v47 }
 0x411   :  { %v1789_v25 = vpop.f32.mrf.mxu3  ;;  %2006 = vmatpush.msra.mxu3 %v1995_v39 }
 0x412   :  { %v1790_v61 = vadd.f32 %v1789_v25, %v1767_v5  ;;  %v1992_v5 = vld [vmem:[%s3979_s9 + $0x48] sm:$0xff]  ;;  %v1991_v25 = vld [vmem:[%s3979_s9 + $0x40] sm:$0xff] }
 0x413   :  { %2007 = vmatpush.msra.mxu3 %v1994_v41 }
 0x414   :  { %v1813_v30 = vadd.f32 %v1812_v26, %v1790_v61 }
 0x415   :  { %2008 = vmatpush.msra.mxu3 %v1993_v21 }
 0x416   :  { %1816 = vxpose.xlu0.b32.end [2/2] (short) (narrow) %v1813_v30, 8  ;;  %1854 = vperm.xlu2 %2125, %v1813_v30   ;;  %v1990_v30 = vld [vmem:[%s3979_s9 + $0x38] sm:$0xff] }
 0x417   :  { %2009 = vmatpush.msra.mxu3 %v1992_v5 }
 0x419   :  { %2010 = vmatpush.msra.mxu3 %v1991_v25 }
 0x41b   :  { %2011 = vmatpush.msra.mxu3 %v1990_v30 }
 0x470   :  { %v1855_v49 = vpop.permute.xlu2 %1854 }
 0x47d   :  { %2126 = vset.pattern.permute.xlu0 %v2273_v6 }
 0x480   :  { %v1850_v56 = vpop.permute.xlu1 %1849 }
 0x4b2   :  { %v1831_v58 = vpop.trf.xlu0 }
 0x4b3   :  { %v1857_v32 = vperm.slane %v1831_v58, 0 }
 0x4b5   :  { %v1858_v52 = vadd.f32 %v1857_v32, %v1850_v56  ;;  %v1859_v14 = vadd.f32 %v1857_v32, %v1855_v49  ;;  %v1989_v32 = vld [vmem:[%s3979_s9 + $0x30] sm:$0xff]  ;;  %v1988_v56 = vld [vmem:[%s3979_s9 + $0x28] sm:$0xff] }
 0x4b6   :  { %2012 = vmatpush.msra.mxu3 %v1989_v32 }
 0x4b7   :  { %v1862_v37 = vmul.f32 0.2, %v1858_v52  ;;  %v1863_v19 = vmul.f32 0.2, %v1859_v14  ;;  %vm1860_vm7 = vcmp.gt.f32.partialorder %v1858_v52, 0.0  ;;  %vm1861_vm8 = vcmp.gt.f32.partialorder %v1859_v14, 0.0 }
 0x4b8   :  { %2013 = vmatpush.msra.mxu3 %v1988_v56 }
 0x4b9   :  { %v1864_v55 = vsel %vm1860_vm7, %v1858_v52, %v1862_v37  ;;  %v1865_v2 = vsel %vm1861_vm8, %v1859_v14, %v1863_v19  ;;  %v1987_v52 = vld [vmem:[%s3979_s9 + $0x20] sm:$0xff]  ;;  %v1986_v14 = vld [vmem:[%s3979_s9 + $0x18] sm:$0xff]  ;;  %v1985_v19 = vld [vmem:[%s3979_s9 + $0x10] sm:$0xff] }
 0x4ba   :  { %v1866_v15 = vadd.f32 %v2237_v20, %v1864_v55  ;;  %v1867_v10 = vadd.f32 %v2238_v16, %v1865_v2  ;;  %2014 = vmatpush.msra.mxu3 %v1987_v52 }
 0x4bc   :  { %v1868_v62 = vsel %vm59_vm0, %v1866_v15, -inf  ;;  %v1871_v0 = vsel %vm59_vm0, %v1867_v10, -inf  ;;  %2015 = vmatpush.msra.mxu3 %v1986_v14 }
 0x4bd   :  { %1869 = vmax.xlane.f32.xlu1 %v1868_v62  ;;  %1872 = vmax.xlane.f32.xlu2 %v1871_v0  ;;  %v1983_v0 = vld [vmem:[%s3979_s9] sm:$0xff] }
 0x4be   :  { %2016 = vmatpush.msra.mxu3 %v1985_v19 }
 0x530   :  { %v1870_v45 = vpop.xlane.xlu1 %1869  ;;  %v1873_v42 = vpop.xlane.xlu2 %1872 }
 0x531   :  { %v1874_v34 = vsub.f32 %v1866_v15, %v1870_v45  ;;  %v1875_v54 = vsub.f32 %v1867_v10, %v1873_v42  ;;  %v1984_v15 = vld [vmem:[%s3979_s9 + $0x8] sm:$0xff]  ;;  %v1959_v10 = vld [vmem:[%s3978_s8] sm:$0x3] }
 0x532   :  { %2017 = vmatpush.msra.mxu3 %v1984_v15  ;;  %v2128_v42 = vld [vmem:[%s3980_s10] ss:$0 sm:$0xff] }
 0x533   :  { %v1876_v1 = vmul.f32 1.442695, %v1874_v34  ;;  %v1878_v3 = vmul.f32 1.442695, %v1875_v54 }
 0x534   :  { %2018 = vmatpush.msra.mxu3 %v1983_v0 }
 0x535   :  { %2225 = vpow2.f32 %v1876_v1 }
 0x536   :  { %2227 = vpow2.f32 %v1878_v3 }
 0x53b   :  { %v2226_v7 = vpop.eup %2225 }
 0x53c   :  { %v2228_v31 = vpop.eup %2227  ;;  %v1880_v12 = vsel %vm59_vm0, %v2226_v7, 0.0 }
 0x53d   :  { %1881 = vadd.xlane.f32.xlu0 %v1880_v12  ;;  %v1883_v13 = vsel %vm59_vm0, %v2228_v31, 0.0 }
 0x53e   :  { %1884 = vadd.xlane.f32.xlu1 %v1883_v13 }
 0x5b0   :  { %v1882_v33 = vpop.xlane.xlu0 %1881 }
 0x5b1   :  { %2229 = vrcp.f32 %v1882_v33  ;;  %v1885_v50 = vpop.xlane.xlu1 %1884  ;;  %v1897_v11 = vand.u32 2147483648, %v1882_v33  ;;  %v1895_v17 = vand.u32 2147483647, %v1882_v33  ;;  %vm1891_vm10 = vweird.f32 %v1882_v33 }
 0x5b2   :  { %2231 = vrcp.f32 %v1885_v50  ;;  %v1911_v38 = vand.u32 2147483648, %v1885_v50  ;;  %vm1905_vm14 = vweird.f32 %v1885_v50  ;;  %v1909_v27 = vand.u32 2147483647, %v1885_v50 }
 0x5b3   :  { %v1898_v18 = vor.u32 1.1754944e-38, %v1897_v11  ;;  %vm1896_vm12 = vcmp.eq.f32.partialorder %v1895_v17, 8.507059e+37 }
 0x5b4   :  { %v1912_v53 = vor.u32 1.1754944e-38, %v1911_v38  ;;  %vm1910_vm1 = vcmp.eq.f32.partialorder %v1909_v27, 8.507059e+37 }
 0x5b7   :  { %v2230_v63 = vpop.eup %2229 }
 0x5b8   :  { %v2232_v46 = vpop.eup %2231  ;;  %v1887_v48 = vmul.f32 %v2230_v63, %v1882_v33  ;;  %vm1892_vm9 = vweird.f32 %v2230_v63 }
 0x5b9   :  { %v1901_v6 = vmul.f32 %v2232_v46, %v1885_v50  ;;  %vm1893_vm11 = vmor %vm1891_vm10, %vm1892_vm9  ;;  %vm1906_vm13 = vweird.f32 %v2232_v46 }
 0x5ba   :  { %v1888_v43 = vsub.f32 1.0, %v1887_v48  ;;  %vm1907_vm15 = vmor %vm1905_vm14, %vm1906_vm13 }
 0x5bb   :  { %v1902_v44 = vsub.f32 1.0, %v1901_v6 }
 0x5bc   :  { %v1889_v60 = vmul.f32 %v2230_v63, %v1888_v43 }
 0x5bd   :  { %v1903_v22 = vmul.f32 %v2232_v46, %v1902_v44 }
 0x5be   :  { %v1890_v9 = vadd.f32 %v2230_v63, %v1889_v60 }
 0x5bf   :  { %v1904_v23 = vadd.f32 %v2232_v46, %v1903_v22 }
 0x5c0   :  { %v1894_v4 = vsel %vm1893_vm11, %v2230_v63, %v1890_v9 }
 0x5c1   :  { %v1899_v59 = vsel %vm1896_vm12, %v1898_v18, %v1894_v4  ;;  %v1908_v28 = vsel %vm1907_vm15, %v2232_v46, %v1904_v23 }
 0x5c2   :  { %v1914_v24 = vmul.f32 %v2226_v7, %v1899_v59  ;;  %v1913_v36 = vsel %vm1910_vm1, %v1912_v53, %v1908_v28 }
 0x5c3   :  { %v1915_v29 = vmul.f32 %v2228_v31, %v1913_v36 }
 0x5c4   :  { %2091 = vmatmul.msk.f32.vlgmr.msra.gmra.mxu1 %vm59_vm0, %v1914_v24 }
 0x5cc   :  { %2092 = vmatmul.msk.f32.gmra.mxu1 %vm59_vm0, %v1915_v29 }
 0x641   :  { %v1943_v40 = vpop.f32.mrf.mxu1 }
 0x642   :  { %v1944_v8 = vadd.f32 %v2127_v35, %v1943_v40 }
 0x644   :  { %v1951_v61 = vmul.f32 1.442695, %v1944_v8  ;;  %vm1949_vm3 = vcmp.gt.f32.partialorder %v1944_v8, 0.0 }
 0x646   :  { %2233 = vpow2.f32 %v1951_v61 }
 0x649   :  { %v1946_v26 = vpop.f32.mrf.mxu1 }
 0x64a   :  { %v1947_v58 = vadd.f32 %v2127_v35, %v1946_v26 }
 0x64c   :  { %v1953_v49 = vmul.f32 1.442695, %v1947_v58  ;;  %v2234_v37 = vpop.eup %2233  ;;  %vm1950_vm2 = vcmp.gt.f32.partialorder %v1947_v58, 0.0 }
 0x64d   :  { %v2093_v20 = vadd.f32 -1.0, %v2234_v37 }
 0x64e   :  { %2235 = vpow2.f32 %v1953_v49 }
 0x64f   :  { %v1957_v62 = vsel %vm1949_vm3, %v1944_v8, %v2093_v20 }
 0x654   :  { %v2236_v55 = vpop.eup %2235 }
 0x655   :  { %v2094_v2 = vadd.f32 -1.0, %v2236_v55 }
 0x657   :  { %v1958_v16 = vsel %vm1950_vm2, %v1947_v58, %v2094_v2 }
 0x658   :  { %1977 = vmatpush.msrb.mxu2 %v1958_v16 }
 0x65a   :  { %1978 = vmatpush.msrb.mxu2 %v1957_v62 }
 0x65b   :  { %2095 = vmatmul.msk.f32.vlgmr.msrb.gmra.mxu2 %vm59_vm0, %v1959_v10 }
 0x6de   :  { %v1980_v45 = vpop.f32.mrf.mxu2 }
 0x6df   :  { %2019 = vmatmul.f32.vlgmr.msra.gmra.mxu3 %v1980_v45 }
 0x762   :  { %v2020_v34 = vpop.f32.mrf.mxu3 }
 0x763   :  { %v2021_v54 = vadd.f32 %v2128_v42, %v2020_v34 }
 0x765   :  { %2024 = vst.msk [vmem:[#allocation2] sm:$0x3] %vm2023_vm4, %v2021_v54 }
 0x766   :  { %2035 = dma.vmem_to_hbm [thread:$0]  %s2031_s16, 32, %s2033_s18, [#allocation3]  }
 0x767   :  { %2263 = dma.done.wait [#allocation3], 32  }
 0x768   :  { %2264 = vsyncadd [#allocation3], 4294967264 }
 0x769   :  { %2040 = vsyncpa [#allocation3], 1 }

</bundles_post_ra>
